<compile_context>
chip_gen: v5e
topology: v5e:2x2
jax: 0.10.0
libtpu: 0.0.40
codegen_flags: <defaults>
</compile_context>

<pallas_src>
import functools
import math

import jax
import jax.numpy as jnp
from jax.experimental import pallas as pl
from jax.experimental.pallas import tpu as pltpu


# -----------------------------------------------------------------------------------
# Fused kernel: 1x1 conv + folded BN + nearest resize (integer H factor, any W size).
# NCHW with the spatial axis flattened onto the TPU lane axis, channels on sublanes.
# Per source row r:
#     c  = W_bn @ x[:, r*Win:(r+1)*Win]        (Cout, Win)       conv (+BN scale folded)
#     er = c @ E_hw + bias                     (Cout, rh*Wout)   nearest resize in W,
#                                                                replicated rh times
# er is exactly the rh*Wout contiguous output lanes that the rh replicated output rows
# of source row r occupy in NCHW memory, so the store is a plain static lane window.
# -----------------------------------------------------------------------------------
def _fused_conv_bn_resize_kernel(x_ref, w_ref, ehw_ref, b_ref, o_ref, *, Bb, tr, Win, Wrep):
    # x_ref:   (Bb, Cin, tr*Win)    source-resolution spatial tile (lane-dense)
    # w_ref:   (Cout, Cin)          BN-folded conv weight  (f32, grid-resident)
    # ehw_ref: (Win, Wrep)          0/1 nearest-resize expansion matrix, Wrep = rh*Wout
    # b_ref:   (Cout, 1)            BN-folded bias         (f32, grid-resident)
    # o_ref:   (Bb, Cout, tr*Wrep)  final output tile (lane-dense)
    w = w_ref[...]
    ehw = ehw_ref[...]
    cout = w.shape[0]
    bias = jnp.broadcast_to(b_ref[...], (cout, Wrep))          # hoisted out of the loops
    # At Cin=4/Cout=8 these matmuls use <1% of the MXU; that's fine -- the kernel is
    # HBM-bound on every generation and the MXU slot is otherwise idle.
    for bi in range(Bb):                 # static unroll; Bb*tr is kept small by the tiler
        for r in range(tr):
            xr = x_ref[bi, :, r * Win:(r + 1) * Win].astype(jnp.float32)   # (Cin, Win)
            c = jnp.dot(w, xr, preferred_element_type=jnp.float32)         # (Cout, Win)
            er = jnp.dot(c, ehw, preferred_element_type=jnp.float32) + bias
            o_ref[bi, :, r * Wrep:(r + 1) * Wrep] = er.astype(o_ref.dtype)


# -----------------------------------------------------------------------------------
# Fallback kernel: lane-dense flat 1x1 conv + BN (resize handled in the wrapper).
# -----------------------------------------------------------------------------------
def _conv_bn_flat_kernel(x_ref, w_ref, b_ref, o_ref):
    # x_ref: (Cin, tn)   w_ref: (Cout, Cin)   b_ref: (Cout, 1)   o_ref: (Cout, tn)
    acc = jnp.dot(w_ref[...], x_ref[...].astype(jnp.float32),
                  preferred_element_type=jnp.float32)
    o_ref[...] = (acc + b_ref[...]).astype(o_ref.dtype)


def _conv_bn_flat(x_flat, w_bn, bias2d, out_dtype, tn_max):
    B, Cin, S = x_flat.shape
    Cout = w_bn.shape[0]
    # Cap the spatial tile so the double-buffered streams stay <= ~8 MiB of VMEM.
    tn_cap = max(128, min(tn_max, ((8 << 20) // (8 * (Cin + Cout))) // 128 * 128))
    tn = S if S <= tn_cap else tn_cap
    return pl.pallas_call(
        _conv_bn_flat_kernel,
        out_shape=jax.ShapeDtypeStruct((B, Cout, S), out_dtype),
        grid=(B, pl.cdiv(S, tn)),
        in_specs=[
            pl.BlockSpec((None, Cin, tn), lambda b, s: (b, 0, s)),
            pl.BlockSpec((Cout, Cin), lambda b, s: (0, 0)),   # grid-resident
            pl.BlockSpec((Cout, 1), lambda b, s: (0, 0)),     # grid-resident
        ],
        out_specs=pl.BlockSpec((None, Cout, tn), lambda b, s: (b, 0, s)),
        compiler_params=pltpu.CompilerParams(
            dimension_semantics=("parallel", "parallel")),
    )(x_flat, w_bn, bias2d)


def _pick_fused_tiles(B, Cin, Cout, Hin, Win, rh, Wout):
    """Pick rows-per-step (tr) and images-per-step (Bb) for the fused kernel.

    tr*Win and tr*rh*Wout must be multiples of 128 (lane tiles) unless tr == Hin
    (full-extent blocks).  Sized against a ~6 MiB double-buffered VMEM budget.
    """
    per_row = (Cin * Win + Cout * rh * Wout) * 4           # bytes per source row (f32)
    budget = 6 << 20
    rows_vmem = max(1, budget // (2 * per_row))
    l_in = 128 // math.gcd(Win, 128)
    l_out = 128 // math.gcd(rh * Wout, 128)
    step = l_in * l_out // math.gcd(l_in, l_out)            # lcm
    max_rows = min(Hin, 64, rows_vmem)
    tr = (max_rows // step) * step
    if tr == 0:
        if Hin <= 128 and 2 * per_row * Hin <= (24 << 20):
            tr = Hin                                        # whole image per grid step
        else:
            return None, None                               # awkward width: use fallback
    out_step = Cout * tr * rh * Wout * 4
    Bb = 1
    if B > 1 and out_step < (256 << 10):                    # amortize ~0.35us/step
        Bb = min(B, 8,
                 max(1, (256 << 10) // max(out_step, 1)),
                 max(1, 128 // tr),
                 max(1, rows_vmem // tr))
    return tr, Bb


def translate_forward(x, y_shape, weight, bn_gamma, bn_beta, bn_mean, bn_var,
                      eps=1e-5, out_dtype=None, tn_max=16384):
    """Translate.forward(x, y): 1x1 conv (no bias) -> BatchNorm2d (inference) ->
    F.interpolate(mode='nearest') to y's spatial size.

    x: (B, Cin, Hin, Win) NCHW; only y_shape[2:] is used.
    Returns (B, Cout, Hout, Wout); dtype = out_dtype or x.dtype (bf16 output halves
    the dominant HBM write stream on v6e/v7x; accumulation stays f32 either way).
    """
    B, Cin, Hin, Win = x.shape
    Hout, Wout = int(y_shape[2]), int(y_shape[3])
    Cout = weight.shape[0]
    odt = x.dtype if out_dtype is None else out_dtype

    # Fold BatchNorm (inference mode) into the conv weight + per-channel bias (f32).
    scale = bn_gamma.astype(jnp.float32) / jnp.sqrt(bn_var.astype(jnp.float32) + eps)
    bias = bn_beta.astype(jnp.float32) - bn_mean.astype(jnp.float32) * scale
    w_bn = weight.reshape(Cout, Cin).astype(jnp.float32) * scale[:, None]   # (Cout, Cin)
    bias2d = bias.reshape(Cout, 1)                                          # (Cout, 1)

    fused = (Hout % Hin == 0)
    if fused:
        rh = Hout // Hin
        tr, Bb = _pick_fused_tiles(B, Cin, Cout, Hin, Win, rh, Wout)
        fused = tr is not None
    if fused:
        # Nearest resize in W as an exact 0/1 matmul (one 1 per column; PyTorch
        # floor(dst*in/out) indexing), tiled rh times along columns so that one source
        # row produces its rh replicated output rows as a single contiguous lane window.
        wi = (jnp.arange(Wout) * Win) // Wout
        e_w = (jnp.arange(Win)[:, None] == wi[None, :]).astype(jnp.float32)   # (Win, Wout)
        e_hw = jnp.tile(e_w, (1, rh))                                         # (Win, rh*Wout)
        wrep = rh * Wout

        s_in, s_out = Hin * Win, Hout * Wout
        x_flat = x.reshape(B, Cin, s_in)                   # merges trailing dims: free
        kernel = functools.partial(_fused_conv_bn_resize_kernel,
                                   Bb=Bb, tr=tr, Win=Win, Wrep=wrep)
        out_flat = pl.pallas_call(
            kernel,
            out_shape=jax.ShapeDtypeStruct((B, Cout, s_out), odt),
            grid=(pl.cdiv(B, Bb), pl.cdiv(Hin, tr)),
            in_specs=[
                pl.BlockSpec((Bb, Cin, tr * Win), lambda b, j: (b, 0, j)),
                pl.BlockSpec((Cout, Cin), lambda b, j: (0, 0)),    # grid-resident
                pl.BlockSpec((Win, wrep), lambda b, j: (0, 0)),    # grid-resident
                pl.BlockSpec((Cout, 1), lambda b, j: (0, 0)),      # grid-resident
            ],
            out_specs=pl.BlockSpec((Bb, Cout, tr * wrep), lambda b, j: (b, 0, j)),
            compiler_params=pltpu.CompilerParams(
                dimension_semantics=("parallel", "parallel")),
        )(x_flat, w_bn, e_hw, bias2d)
        return out_flat.reshape(B, Cout, Hout, Wout)

    # ---- Fallback: non-integer H factor (or awkward width). Resize on the cheaper
    # side in the wrapper; the matmul itself stays in the lane-dense flat kernel. ----
    # TODO(synk): fuse this general gather into the kernel too (scalar-prefetched
    # Element / lane-gather index maps) instead of paying one extra HBM pass.
    hi = (jnp.arange(Hout) * Hin) // Hout
    wi = (jnp.arange(Wout) * Win) // Wout
    s_in, s_out = Hin * Win, Hout * Wout
    if Cout * s_in <= Cin * s_out:
        out_flat = _conv_bn_flat(x.reshape(B, Cin, s_in), w_bn, bias2d, odt, tn_max)
        o4 = out_flat.reshape(B, Cout, Hin, Win)
        return o4[:, :, hi[:, None], wi[None, :]]
    xr = x[:, :, hi[:, None], wi[None, :]]
    out_flat = _conv_bn_flat(xr.reshape(B, Cin, s_out), w_bn, bias2d, odt, tn_max)
    return out_flat.reshape(B, Cout, Hout, Wout)


def reference_forward(x, y_shape, weight, bn_gamma, bn_beta, bn_mean, bn_var, eps=1e-5):
    """Plain-JAX reference with the original op order: conv -> BN -> nearest interpolate."""
    B, Cin, Hin, Win = x.shape
    Hout, Wout = int(y_shape[2]), int(y_shape[3])
    Cout = weight.shape[0]
    w2d = weight.reshape(Cout, Cin).astype(jnp.float32)
    conv = jnp.einsum("bchw,oc->bohw", x.astype(jnp.float32), w2d)
    scale = bn_gamma / jnp.sqrt(bn_var + eps)
    bn = (conv * scale[None, :, None, None]
          + (bn_beta - bn_mean * scale)[None, :, None, None])
    hi = (jnp.arange(Hout) * Hin) // Hout
    wi = (jnp.arange(Wout) * Win) // Wout
    return bn[:, :, hi][:, :, :, wi]


if __name__ == "__main__":
    # Translate(in_channel=4, out_channel=8, mid_channel=16)  (mid_channel is unused
    # by the module's forward, as in the PyTorch source).
    B, Cin, Cout = 2, 4, 8
    Hin, Win = 16, 16

    key = jax.random.PRNGKey(0)
    kx, kw, kg, kb, km, kv = jax.random.split(key, 6)
    x = jax.random.normal(kx, (B, Cin, Hin, Win), dtype=jnp.float32)
    conv_weight = jax.random.normal(kw, (Cout, Cin, 1, 1), dtype=jnp.float32) * 0.1
    bn_gamma = 1.0 + 0.1 * jax.random.normal(kg, (Cout,), dtype=jnp.float32)
    bn_beta = 0.1 * jax.random.normal(kb, (Cout,), dtype=jnp.float32)
    bn_mean = 0.05 * jax.random.normal(km, (Cout,), dtype=jnp.float32)
    bn_var = 1.0 + 0.1 * jax.nn.softplus(jax.random.normal(kv, (Cout,), dtype=jnp.float32))
    params = (conv_weight, bn_gamma, bn_beta, bn_mean, bn_var)

    # 1) Fully fused path: 2x nearest upsample (the common ReviewKD case).
    y_up = (B, 3, 32, 32)
    ref = reference_forward(x, y_up, *params)
    out = jax.block_until_ready(translate_forward(x, y_up, *params))
    assert out.shape == (B, Cout, 32, 32), out.shape
    assert jnp.allclose(out, ref, atol=1e-4, rtol=1e-4), float(jnp.max(jnp.abs(out - ref)))

    # 2) Identity spatial size still goes through the fused kernel (rh=1, E = I).
    y_id = (B, 3, 16, 16)
    ref_id = reference_forward(x, y_id, *params)
    out_id = jax.block_until_ready(translate_forward(x, y_id, *params))
    assert out_id.shape == (B, Cout, 16, 16), out_id.shape
    assert jnp.allclose(out_id, ref_id, atol=1e-4, rtol=1e-4), \
        float(jnp.max(jnp.abs(out_id - ref_id)))

    # 3) Non-integer scale factor -> fallback path (resize on the cheaper side).
    y_odd = (B, 3, 24, 24)
    ref_odd = reference_forward(x, y_odd, *params)
    out_odd = jax.block_until_ready(translate_forward(x, y_odd, *params))
    assert out_odd.shape == (B, Cout, 24, 24), out_odd.shape
    assert jnp.allclose(out_odd, ref_odd, atol=1e-4, rtol=1e-4), \
        float(jnp.max(jnp.abs(out_odd - ref_odd)))

    # 4) Optional bf16 output (halves the dominant HBM write stream); epilogue stays f32.
    out_bf16 = jax.block_until_ready(
        translate_forward(x, y_up, *params, out_dtype=jnp.bfloat16))
    assert out_bf16.dtype == jnp.bfloat16
    assert jnp.allclose(out_bf16.astype(jnp.float32), ref, atol=5e-2, rtol=5e-2), \
        float(jnp.max(jnp.abs(out_bf16.astype(jnp.float32) - ref)))

    print("KERNEL_OK")
</pallas_src>

<mosaic_0001>
module attributes {stable_mosaic.version = 11 : i64} {
  func.func @_fused_conv_bn_resize_kernel(%arg0: i32, %arg1: i32, %arg2: memref<2x4x256xf32, #tpu.memory_space<vmem>>, %arg3: memref<8x4xf32, #tpu.memory_space<vmem>>, %arg4: memref<16x64xf32, #tpu.memory_space<vmem>>, %arg5: memref<8x1xf32, #tpu.memory_space<vmem>>, %arg6: memref<2x8x1024xf32, #tpu.memory_space<vmem>>) attributes {dimension_semantics = [#tpu.dimension_semantics<parallel>, #tpu.dimension_semantics<parallel>], iteration_bounds = array<i64: 1, 1>, scalar_prefetch = 0 : i64, scratch_operands = 0 : i64, tpu.core_type = #tpu.core_type<tc>, window_params = [{transform_indices = @transform_0, window_bounds = array<i64: 2, 4, 256>}, {pipeline_mode = #tpu.pipeline_mode<synchronous>, transform_indices = @transform_1, window_bounds = array<i64: 8, 4>}, {pipeline_mode = #tpu.pipeline_mode<synchronous>, transform_indices = @transform_2, window_bounds = array<i64: 16, 64>}, {pipeline_mode = #tpu.pipeline_mode<synchronous>, transform_indices = @transform_3, window_bounds = array<i64: 8, 1>}, {transform_indices = @transform_4, window_bounds = array<i64: 2, 8, 1024>}]} {
    %c0 = arith.constant 0 : index
    %c0_0 = arith.constant 0 : index
    %0 = vector.load %arg3[%c0, %c0_0] : memref<8x4xf32, #tpu.memory_space<vmem>>, vector<8x4xf32>
    %c0_1 = arith.constant 0 : index
    %c0_2 = arith.constant 0 : index
    %1 = vector.load %arg4[%c0_1, %c0_2] : memref<16x64xf32, #tpu.memory_space<vmem>>, vector<16x64xf32>
    %c0_3 = arith.constant 0 : index
    %c0_4 = arith.constant 0 : index
    %2 = vector.load %arg5[%c0_3, %c0_4] : memref<8x1xf32, #tpu.memory_space<vmem>>, vector<8x1xf32>
    %3 = vector.shape_cast %2 : vector<8x1xf32> to vector<8x1xf32>
    %4 = vector.broadcast %3 : vector<8x1xf32> to vector<8x64xf32>
    %c0_5 = arith.constant 0 : index
    %c0_6 = arith.constant 0 : index
    %c0_7 = arith.constant 0 : index
    %5 = vector.load %arg2[%c0_5, %c0_6, %c0_7] : memref<2x4x256xf32, #tpu.memory_space<vmem>>, vector<1x4x16xf32>
    %6 = vector.shape_cast %5 : vector<1x4x16xf32> to vector<4x16xf32>
    %cst = arith.constant dense<0.000000e+00> : vector<8x16xf32>
    %7 = tpu.matmul %0, %6, %cst {dimension_numbers = #tpu.dot_dimension_numbers<[1], [0], [0], [1], [0, 0, 1, 1], [], []>} : vector<8x4xf32>, vector<4x16xf32>, vector<8x16xf32> -> vector<8x16xf32>
    %cst_8 = arith.constant dense<0.000000e+00> : vector<8x64xf32>
    %8 = tpu.matmul %7, %1, %cst_8 {dimension_numbers = #tpu.dot_dimension_numbers<[1], [0], [0], [1], [0, 0, 1, 1], [], []>} : vector<8x16xf32>, vector<16x64xf32>, vector<8x64xf32> -> vector<8x64xf32>
    %9 = arith.addf %8, %4 : vector<8x64xf32>
    %c0_9 = arith.constant 0 : index
    %c0_10 = arith.constant 0 : index
    %c0_11 = arith.constant 0 : index
    %10 = vector.load %arg6[%c0_9, %c0_10, %c0_11] : memref<2x8x1024xf32, #tpu.memory_space<vmem>>, vector<1x8x64xf32>
    %11 = vector.shape_cast %10 : vector<1x8x64xf32> to vector<8x64xf32>
    %12 = vector.shape_cast %9 : vector<8x64xf32> to vector<1x8x64xf32>
    tpu.vector_store %arg6[%c0_9, %c0_10, %c0_11], %12 {strides = array<i32>} : memref<2x8x1024xf32, #tpu.memory_space<vmem>>, vector<1x8x64xf32>,
    %c0_12 = arith.constant 0 : index
    %c0_13 = arith.constant 0 : index
    %c16 = arith.constant 16 : index
    %13 = vector.load %arg2[%c0_12, %c0_13, %c16] : memref<2x4x256xf32, #tpu.memory_space<vmem>>, vector<1x4x16xf32>
    %14 = vector.shape_cast %13 : vector<1x4x16xf32> to vector<4x16xf32>
    %cst_14 = arith.constant dense<0.000000e+00> : vector<8x16xf32>
    %15 = tpu.matmul %0, %14, %cst_14 {dimension_numbers = #tpu.dot_dimension_numbers<[1], [0], [0], [1], [0, 0, 1, 1], [], []>} : vector<8x4xf32>, vector<4x16xf32>, vector<8x16xf32> -> vector<8x16xf32>
    %cst_15 = arith.constant dense<0.000000e+00> : vector<8x64xf32>
    %16 = tpu.matmul %15, %1, %cst_15 {dimension_numbers = #tpu.dot_dimension_numbers<[1], [0], [0], [1], [0, 0, 1, 1], [], []>} : vector<8x16xf32>, vector<16x64xf32>, vector<8x64xf32> -> vector<8x64xf32>
    %17 = arith.addf %16, %4 : vector<8x64xf32>
    %c0_16 = arith.constant 0 : index
    %c0_17 = arith.constant 0 : index
    %c64 = arith.constant 64 : index
    %18 = vector.load %arg6[%c0_16, %c0_17, %c64] : memref<2x8x1024xf32, #tpu.memory_space<vmem>>, vector<1x8x64xf32>
    %19 = vector.shape_cast %18 : vector<1x8x64xf32> to vector<8x64xf32>
    %20 = vector.shape_cast %17 : vector<8x64xf32> to vector<1x8x64xf32>
    tpu.vector_store %arg6[%c0_16, %c0_17, %c64], %20 {strides = array<i32>} : memref<2x8x1024xf32, #tpu.memory_space<vmem>>, vector<1x8x64xf32>,
    %c0_18 = arith.constant 0 : index
    %c0_19 = arith.constant 0 : index
    %c32 = arith.constant 32 : index
    %21 = vector.load %arg2[%c0_18, %c0_19, %c32] : memref<2x4x256xf32, #tpu.memory_space<vmem>>, vector<1x4x16xf32>
    %22 = vector.shape_cast %21 : vector<1x4x16xf32> to vector<4x16xf32>
    %cst_20 = arith.constant dense<0.000000e+00> : vector<8x16xf32>
    %23 = tpu.matmul %0, %22, %cst_20 {dimension_numbers = #tpu.dot_dimension_numbers<[1], [0], [0], [1], [0, 0, 1, 1], [], []>} : vector<8x4xf32>, vector<4x16xf32>, vector<8x16xf32> -> vector<8x16xf32>
    %cst_21 = arith.constant dense<0.000000e+00> : vector<8x64xf32>
    %24 = tpu.matmul %23, %1, %cst_21 {dimension_numbers = #tpu.dot_dimension_numbers<[1], [0], [0], [1], [0, 0, 1, 1], [], []>} : vector<8x16xf32>, vector<16x64xf32>, vector<8x64xf32> -> vector<8x64xf32>
    %25 = arith.addf %24, %4 : vector<8x64xf32>
    %c0_22 = arith.constant 0 : index
    %c0_23 = arith.constant 0 : index
    %c128 = arith.constant 128 : index
    %26 = vector.load %arg6[%c0_22, %c0_23, %c128] : memref<2x8x1024xf32, #tpu.memory_space<vmem>>, vector<1x8x64xf32>
    %27 = vector.shape_cast %26 : vector<1x8x64xf32> to vector<8x64xf32>
    %28 = vector.shape_cast %25 : vector<8x64xf32> to vector<1x8x64xf32>
    tpu.vector_store %arg6[%c0_22, %c0_23, %c128], %28 {strides = array<i32>} : memref<2x8x1024xf32, #tpu.memory_space<vmem>>, vector<1x8x64xf32>,
    %c0_24 = arith.constant 0 : index
    %c0_25 = arith.constant 0 : index
    %c48 = arith.constant 48 : index
    %29 = vector.load %arg2[%c0_24, %c0_25, %c48] : memref<2x4x256xf32, #tpu.memory_space<vmem>>, vector<1x4x16xf32>
    %30 = vector.shape_cast %29 : vector<1x4x16xf32> to vector<4x16xf32>
    %cst_26 = arith.constant dense<0.000000e+00> : vector<8x16xf32>
    %31 = tpu.matmul %0, %30, %cst_26 {dimension_numbers = #tpu.dot_dimension_numbers<[1], [0], [0], [1], [0, 0, 1, 1], [], []>} : vector<8x4xf32>, vector<4x16xf32>, vector<8x16xf32> -> vector<8x16xf32>
    %cst_27 = arith.constant dense<0.000000e+00> : vector<8x64xf32>
    %32 = tpu.matmul %31, %1, %cst_27 {dimension_numbers = #tpu.dot_dimension_numbers<[1], [0], [0], [1], [0, 0, 1, 1], [], []>} : vector<8x16xf32>, vector<16x64xf32>, vector<8x64xf32> -> vector<8x64xf32>
    %33 = arith.addf %32, %4 : vector<8x64xf32>
    %c0_28 = arith.constant 0 : index
    %c0_29 = arith.constant 0 : index
    %c192 = arith.constant 192 : index
    %34 = vector.load %arg6[%c0_28, %c0_29, %c192] : memref<2x8x1024xf32, #tpu.memory_space<vmem>>, vector<1x8x64xf32>
    %35 = vector.shape_cast %34 : vector<1x8x64xf32> to vector<8x64xf32>
    %36 = vector.shape_cast %33 : vector<8x64xf32> to vector<1x8x64xf32>
    tpu.vector_store %arg6[%c0_28, %c0_29, %c192], %36 {strides = array<i32>} : memref<2x8x1024xf32, #tpu.memory_space<vmem>>, vector<1x8x64xf32>,
    %c0_30 = arith.constant 0 : index
    %c0_31 = arith.constant 0 : index
    %c64_32 = arith.constant 64 : index
    %37 = vector.load %arg2[%c0_30, %c0_31, %c64_32] : memref<2x4x256xf32, #tpu.memory_space<vmem>>, vector<1x4x16xf32>
    %38 = vector.shape_cast %37 : vector<1x4x16xf32> to vector<4x16xf32>
    %cst_33 = arith.constant dense<0.000000e+00> : vector<8x16xf32>
    %39 = tpu.matmul %0, %38, %cst_33 {dimension_numbers = #tpu.dot_dimension_numbers<[1], [0], [0], [1], [0, 0, 1, 1], [], []>} : vector<8x4xf32>, vector<4x16xf32>, vector<8x16xf32> -> vector<8x16xf32>
    %cst_34 = arith.constant dense<0.000000e+00> : vector<8x64xf32>
    %40 = tpu.matmul %39, %1, %cst_34 {dimension_numbers = #tpu.dot_dimension_numbers<[1], [0], [0], [1], [0, 0, 1, 1], [], []>} : vector<8x16xf32>, vector<16x64xf32>, vector<8x64xf32> -> vector<8x64xf32>
    %41 = arith.addf %40, %4 : vector<8x64xf32>
    %c0_35 = arith.constant 0 : index
    %c0_36 = arith.constant 0 : index
    %c256 = arith.constant 256 : index
    %42 = vector.load %arg6[%c0_35, %c0_36, %c256] : memref<2x8x1024xf32, #tpu.memory_space<vmem>>, vector<1x8x64xf32>
    %43 = vector.shape_cast %42 : vector<1x8x64xf32> to vector<8x64xf32>
    %44 = vector.shape_cast %41 : vector<8x64xf32> to vector<1x8x64xf32>
    tpu.vector_store %arg6[%c0_35, %c0_36, %c256], %44 {strides = array<i32>} : memref<2x8x1024xf32, #tpu.memory_space<vmem>>, vector<1x8x64xf32>,
    %c0_37 = arith.constant 0 : index
    %c0_38 = arith.constant 0 : index
    %c80 = arith.constant 80 : index
    %45 = vector.load %arg2[%c0_37, %c0_38, %c80] : memref<2x4x256xf32, #tpu.memory_space<vmem>>, vector<1x4x16xf32>
    %46 = vector.shape_cast %45 : vector<1x4x16xf32> to vector<4x16xf32>
    %cst_39 = arith.constant dense<0.000000e+00> : vector<8x16xf32>
    %47 = tpu.matmul %0, %46, %cst_39 {dimension_numbers = #tpu.dot_dimension_numbers<[1], [0], [0], [1], [0, 0, 1, 1], [], []>} : vector<8x4xf32>, vector<4x16xf32>, vector<8x16xf32> -> vector<8x16xf32>
    %cst_40 = arith.constant dense<0.000000e+00> : vector<8x64xf32>
    %48 = tpu.matmul %47, %1, %cst_40 {dimension_numbers = #tpu.dot_dimension_numbers<[1], [0], [0], [1], [0, 0, 1, 1], [], []>} : vector<8x16xf32>, vector<16x64xf32>, vector<8x64xf32> -> vector<8x64xf32>
    %49 = arith.addf %48, %4 : vector<8x64xf32>
    %c0_41 = arith.constant 0 : index
    %c0_42 = arith.constant 0 : index
    %c320 = arith.constant 320 : index
    %50 = vector.load %arg6[%c0_41, %c0_42, %c320] : memref<2x8x1024xf32, #tpu.memory_space<vmem>>, vector<1x8x64xf32>
    %51 = vector.shape_cast %50 : vector<1x8x64xf32> to vector<8x64xf32>
    %52 = vector.shape_cast %49 : vector<8x64xf32> to vector<1x8x64xf32>
    tpu.vector_store %arg6[%c0_41, %c0_42, %c320], %52 {strides = array<i32>} : memref<2x8x1024xf32, #tpu.memory_space<vmem>>, vector<1x8x64xf32>,
    %c0_43 = arith.constant 0 : index
    %c0_44 = arith.constant 0 : index
    %c96 = arith.constant 96 : index
    %53 = vector.load %arg2[%c0_43, %c0_44, %c96] : memref<2x4x256xf32, #tpu.memory_space<vmem>>, vector<1x4x16xf32>
    %54 = vector.shape_cast %53 : vector<1x4x16xf32> to vector<4x16xf32>
    %cst_45 = arith.constant dense<0.000000e+00> : vector<8x16xf32>
    %55 = tpu.matmul %0, %54, %cst_45 {dimension_numbers = #tpu.dot_dimension_numbers<[1], [0], [0], [1], [0, 0, 1, 1], [], []>} : vector<8x4xf32>, vector<4x16xf32>, vector<8x16xf32> -> vector<8x16xf32>
    %cst_46 = arith.constant dense<0.000000e+00> : vector<8x64xf32>
    %56 = tpu.matmul %55, %1, %cst_46 {dimension_numbers = #tpu.dot_dimension_numbers<[1], [0], [0], [1], [0, 0, 1, 1], [], []>} : vector<8x16xf32>, vector<16x64xf32>, vector<8x64xf32> -> vector<8x64xf32>
    %57 = arith.addf %56, %4 : vector<8x64xf32>
    %c0_47 = arith.constant 0 : index
    %c0_48 = arith.constant 0 : index
    %c384 = arith.constant 384 : index
    %58 = vector.load %arg6[%c0_47, %c0_48, %c384] : memref<2x8x1024xf32, #tpu.memory_space<vmem>>, vector<1x8x64xf32>
    %59 = vector.shape_cast %58 : vector<1x8x64xf32> to vector<8x64xf32>
    %60 = vector.shape_cast %57 : vector<8x64xf32> to vector<1x8x64xf32>
    tpu.vector_store %arg6[%c0_47, %c0_48, %c384], %60 {strides = array<i32>} : memref<2x8x1024xf32, #tpu.memory_space<vmem>>, vector<1x8x64xf32>,
    %c0_49 = arith.constant 0 : index
    %c0_50 = arith.constant 0 : index
    %c112 = arith.constant 112 : index
    %61 = vector.load %arg2[%c0_49, %c0_50, %c112] : memref<2x4x256xf32, #tpu.memory_space<vmem>>, vector<1x4x16xf32>
    %62 = vector.shape_cast %61 : vector<1x4x16xf32> to vector<4x16xf32>
    %cst_51 = arith.constant dense<0.000000e+00> : vector<8x16xf32>
    %63 = tpu.matmul %0, %62, %cst_51 {dimension_numbers = #tpu.dot_dimension_numbers<[1], [0], [0], [1], [0, 0, 1, 1], [], []>} : vector<8x4xf32>, vector<4x16xf32>, vector<8x16xf32> -> vector<8x16xf32>
    %cst_52 = arith.constant dense<0.000000e+00> : vector<8x64xf32>
    %64 = tpu.matmul %63, %1, %cst_52 {dimension_numbers = #tpu.dot_dimension_numbers<[1], [0], [0], [1], [0, 0, 1, 1], [], []>} : vector<8x16xf32>, vector<16x64xf32>, vector<8x64xf32> -> vector<8x64xf32>
    %65 = arith.addf %64, %4 : vector<8x64xf32>
    %c0_53 = arith.constant 0 : index
    %c0_54 = arith.constant 0 : index
    %c448 = arith.constant 448 : index
    %66 = vector.load %arg6[%c0_53, %c0_54, %c448] : memref<2x8x1024xf32, #tpu.memory_space<vmem>>, vector<1x8x64xf32>
    %67 = vector.shape_cast %66 : vector<1x8x64xf32> to vector<8x64xf32>
    %68 = vector.shape_cast %65 : vector<8x64xf32> to vector<1x8x64xf32>
    tpu.vector_store %arg6[%c0_53, %c0_54, %c448], %68 {strides = array<i32>} : memref<2x8x1024xf32, #tpu.memory_space<vmem>>, vector<1x8x64xf32>,
    %c0_55 = arith.constant 0 : index
    %c0_56 = arith.constant 0 : index
    %c128_57 = arith.constant 128 : index
    %69 = vector.load %arg2[%c0_55, %c0_56, %c128_57] : memref<2x4x256xf32, #tpu.memory_space<vmem>>, vector<1x4x16xf32>
    %70 = vector.shape_cast %69 : vector<1x4x16xf32> to vector<4x16xf32>
    %cst_58 = arith.constant dense<0.000000e+00> : vector<8x16xf32>
    %71 = tpu.matmul %0, %70, %cst_58 {dimension_numbers = #tpu.dot_dimension_numbers<[1], [0], [0], [1], [0, 0, 1, 1], [], []>} : vector<8x4xf32>, vector<4x16xf32>, vector<8x16xf32> -> vector<8x16xf32>
    %cst_59 = arith.constant dense<0.000000e+00> : vector<8x64xf32>
    %72 = tpu.matmul %71, %1, %cst_59 {dimension_numbers = #tpu.dot_dimension_numbers<[1], [0], [0], [1], [0, 0, 1, 1], [], []>} : vector<8x16xf32>, vector<16x64xf32>, vector<8x64xf32> -> vector<8x64xf32>
    %73 = arith.addf %72, %4 : vector<8x64xf32>
    %c0_60 = arith.constant 0 : index
    %c0_61 = arith.constant 0 : index
    %c512 = arith.constant 512 : index
    %74 = vector.load %arg6[%c0_60, %c0_61, %c512] : memref<2x8x1024xf32, #tpu.memory_space<vmem>>, vector<1x8x64xf32>
    %75 = vector.shape_cast %74 : vector<1x8x64xf32> to vector<8x64xf32>
    %76 = vector.shape_cast %73 : vector<8x64xf32> to vector<1x8x64xf32>
    tpu.vector_store %arg6[%c0_60, %c0_61, %c512], %76 {strides = array<i32>} : memref<2x8x1024xf32, #tpu.memory_space<vmem>>, vector<1x8x64xf32>,
    %c0_62 = arith.constant 0 : index
    %c0_63 = arith.constant 0 : index
    %c144 = arith.constant 144 : index
    %77 = vector.load %arg2[%c0_62, %c0_63, %c144] : memref<2x4x256xf32, #tpu.memory_space<vmem>>, vector<1x4x16xf32>
    %78 = vector.shape_cast %77 : vector<1x4x16xf32> to vector<4x16xf32>
    %cst_64 = arith.constant dense<0.000000e+00> : vector<8x16xf32>
    %79 = tpu.matmul %0, %78, %cst_64 {dimension_numbers = #tpu.dot_dimension_numbers<[1], [0], [0], [1], [0, 0, 1, 1], [], []>} : vector<8x4xf32>, vector<4x16xf32>, vector<8x16xf32> -> vector<8x16xf32>
    %cst_65 = arith.constant dense<0.000000e+00> : vector<8x64xf32>
    %80 = tpu.matmul %79, %1, %cst_65 {dimension_numbers = #tpu.dot_dimension_numbers<[1], [0], [0], [1], [0, 0, 1, 1], [], []>} : vector<8x16xf32>, vector<16x64xf32>, vector<8x64xf32> -> vector<8x64xf32>
    %81 = arith.addf %80, %4 : vector<8x64xf32>
    %c0_66 = arith.constant 0 : index
    %c0_67 = arith.constant 0 : index
    %c576 = arith.constant 576 : index
    %82 = vector.load %arg6[%c0_66, %c0_67, %c576] : memref<2x8x1024xf32, #tpu.memory_space<vmem>>, vector<1x8x64xf32>
    %83 = vector.shape_cast %82 : vector<1x8x64xf32> to vector<8x64xf32>
    %84 = vector.shape_cast %81 : vector<8x64xf32> to vector<1x8x64xf32>
    tpu.vector_store %arg6[%c0_66, %c0_67, %c576], %84 {strides = array<i32>} : memref<2x8x1024xf32, #tpu.memory_space<vmem>>, vector<1x8x64xf32>,
    %c0_68 = arith.constant 0 : index
    %c0_69 = arith.constant 0 : index
    %c160 = arith.constant 160 : index
    %85 = vector.load %arg2[%c0_68, %c0_69, %c160] : memref<2x4x256xf32, #tpu.memory_space<vmem>>, vector<1x4x16xf32>
    %86 = vector.shape_cast %85 : vector<1x4x16xf32> to vector<4x16xf32>
    %cst_70 = arith.constant dense<0.000000e+00> : vector<8x16xf32>
    %87 = tpu.matmul %0, %86, %cst_70 {dimension_numbers = #tpu.dot_dimension_numbers<[1], [0], [0], [1], [0, 0, 1, 1], [], []>} : vector<8x4xf32>, vector<4x16xf32>, vector<8x16xf32> -> vector<8x16xf32>
    %cst_71 = arith.constant dense<0.000000e+00> : vector<8x64xf32>
    %88 = tpu.matmul %87, %1, %cst_71 {dimension_numbers = #tpu.dot_dimension_numbers<[1], [0], [0], [1], [0, 0, 1, 1], [], []>} : vector<8x16xf32>, vector<16x64xf32>, vector<8x64xf32> -> vector<8x64xf32>
    %89 = arith.addf %88, %4 : vector<8x64xf32>
    %c0_72 = arith.constant 0 : index
    %c0_73 = arith.constant 0 : index
    %c640 = arith.constant 640 : index
    %90 = vector.load %arg6[%c0_72, %c0_73, %c640] : memref<2x8x1024xf32, #tpu.memory_space<vmem>>, vector<1x8x64xf32>
    %91 = vector.shape_cast %90 : vector<1x8x64xf32> to vector<8x64xf32>
    %92 = vector.shape_cast %89 : vector<8x64xf32> to vector<1x8x64xf32>
    tpu.vector_store %arg6[%c0_72, %c0_73, %c640], %92 {strides = array<i32>} : memref<2x8x1024xf32, #tpu.memory_space<vmem>>, vector<1x8x64xf32>,
    %c0_74 = arith.constant 0 : index
    %c0_75 = arith.constant 0 : index
    %c176 = arith.constant 176 : index
    %93 = vector.load %arg2[%c0_74, %c0_75, %c176] : memref<2x4x256xf32, #tpu.memory_space<vmem>>, vector<1x4x16xf32>
    %94 = vector.shape_cast %93 : vector<1x4x16xf32> to vector<4x16xf32>
    %cst_76 = arith.constant dense<0.000000e+00> : vector<8x16xf32>
    %95 = tpu.matmul %0, %94, %cst_76 {dimension_numbers = #tpu.dot_dimension_numbers<[1], [0], [0], [1], [0, 0, 1, 1], [], []>} : vector<8x4xf32>, vector<4x16xf32>, vector<8x16xf32> -> vector<8x16xf32>
    %cst_77 = arith.constant dense<0.000000e+00> : vector<8x64xf32>
    %96 = tpu.matmul %95, %1, %cst_77 {dimension_numbers = #tpu.dot_dimension_numbers<[1], [0], [0], [1], [0, 0, 1, 1], [], []>} : vector<8x16xf32>, vector<16x64xf32>, vector<8x64xf32> -> vector<8x64xf32>
    %97 = arith.addf %96, %4 : vector<8x64xf32>
    %c0_78 = arith.constant 0 : index
    %c0_79 = arith.constant 0 : index
    %c704 = arith.constant 704 : index
    %98 = vector.load %arg6[%c0_78, %c0_79, %c704] : memref<2x8x1024xf32, #tpu.memory_space<vmem>>, vector<1x8x64xf32>
    %99 = vector.shape_cast %98 : vector<1x8x64xf32> to vector<8x64xf32>
    %100 = vector.shape_cast %97 : vector<8x64xf32> to vector<1x8x64xf32>
    tpu.vector_store %arg6[%c0_78, %c0_79, %c704], %100 {strides = array<i32>} : memref<2x8x1024xf32, #tpu.memory_space<vmem>>, vector<1x8x64xf32>,
    %c0_80 = arith.constant 0 : index
    %c0_81 = arith.constant 0 : index
    %c192_82 = arith.constant 192 : index
    %101 = vector.load %arg2[%c0_80, %c0_81, %c192_82] : memref<2x4x256xf32, #tpu.memory_space<vmem>>, vector<1x4x16xf32>
    %102 = vector.shape_cast %101 : vector<1x4x16xf32> to vector<4x16xf32>
    %cst_83 = arith.constant dense<0.000000e+00> : vector<8x16xf32>
    %103 = tpu.matmul %0, %102, %cst_83 {dimension_numbers = #tpu.dot_dimension_numbers<[1], [0], [0], [1], [0, 0, 1, 1], [], []>} : vector<8x4xf32>, vector<4x16xf32>, vector<8x16xf32> -> vector<8x16xf32>
    %cst_84 = arith.constant dense<0.000000e+00> : vector<8x64xf32>
    %104 = tpu.matmul %103, %1, %cst_84 {dimension_numbers = #tpu.dot_dimension_numbers<[1], [0], [0], [1], [0, 0, 1, 1], [], []>} : vector<8x16xf32>, vector<16x64xf32>, vector<8x64xf32> -> vector<8x64xf32>
    %105 = arith.addf %104, %4 : vector<8x64xf32>
    %c0_85 = arith.constant 0 : index
    %c0_86 = arith.constant 0 : index
    %c768 = arith.constant 768 : index
    %106 = vector.load %arg6[%c0_85, %c0_86, %c768] : memref<2x8x1024xf32, #tpu.memory_space<vmem>>, vector<1x8x64xf32>
    %107 = vector.shape_cast %106 : vector<1x8x64xf32> to vector<8x64xf32>
    %108 = vector.shape_cast %105 : vector<8x64xf32> to vector<1x8x64xf32>
    tpu.vector_store %arg6[%c0_85, %c0_86, %c768], %108 {strides = array<i32>} : memref<2x8x1024xf32, #tpu.memory_space<vmem>>, vector<1x8x64xf32>,
    %c0_87 = arith.constant 0 : index
    %c0_88 = arith.constant 0 : index
    %c208 = arith.constant 208 : index
    %109 = vector.load %arg2[%c0_87, %c0_88, %c208] : memref<2x4x256xf32, #tpu.memory_space<vmem>>, vector<1x4x16xf32>
    %110 = vector.shape_cast %109 : vector<1x4x16xf32> to vector<4x16xf32>
    %cst_89 = arith.constant dense<0.000000e+00> : vector<8x16xf32>
    %111 = tpu.matmul %0, %110, %cst_89 {dimension_numbers = #tpu.dot_dimension_numbers<[1], [0], [0], [1], [0, 0, 1, 1], [], []>} : vector<8x4xf32>, vector<4x16xf32>, vector<8x16xf32> -> vector<8x16xf32>
    %cst_90 = arith.constant dense<0.000000e+00> : vector<8x64xf32>
    %112 = tpu.matmul %111, %1, %cst_90 {dimension_numbers = #tpu.dot_dimension_numbers<[1], [0], [0], [1], [0, 0, 1, 1], [], []>} : vector<8x16xf32>, vector<16x64xf32>, vector<8x64xf32> -> vector<8x64xf32>
    %113 = arith.addf %112, %4 : vector<8x64xf32>
    %c0_91 = arith.constant 0 : index
    %c0_92 = arith.constant 0 : index
    %c832 = arith.constant 832 : index
    %114 = vector.load %arg6[%c0_91, %c0_92, %c832] : memref<2x8x1024xf32, #tpu.memory_space<vmem>>, vector<1x8x64xf32>
    %115 = vector.shape_cast %114 : vector<1x8x64xf32> to vector<8x64xf32>
    %116 = vector.shape_cast %113 : vector<8x64xf32> to vector<1x8x64xf32>
    tpu.vector_store %arg6[%c0_91, %c0_92, %c832], %116 {strides = array<i32>} : memref<2x8x1024xf32, #tpu.memory_space<vmem>>, vector<1x8x64xf32>,
    %c0_93 = arith.constant 0 : index
    %c0_94 = arith.constant 0 : index
    %c224 = arith.constant 224 : index
    %117 = vector.load %arg2[%c0_93, %c0_94, %c224] : memref<2x4x256xf32, #tpu.memory_space<vmem>>, vector<1x4x16xf32>
    %118 = vector.shape_cast %117 : vector<1x4x16xf32> to vector<4x16xf32>
    %cst_95 = arith.constant dense<0.000000e+00> : vector<8x16xf32>
    %119 = tpu.matmul %0, %118, %cst_95 {dimension_numbers = #tpu.dot_dimension_numbers<[1], [0], [0], [1], [0, 0, 1, 1], [], []>} : vector<8x4xf32>, vector<4x16xf32>, vector<8x16xf32> -> vector<8x16xf32>
    %cst_96 = arith.constant dense<0.000000e+00> : vector<8x64xf32>
    %120 = tpu.matmul %119, %1, %cst_96 {dimension_numbers = #tpu.dot_dimension_numbers<[1], [0], [0], [1], [0, 0, 1, 1], [], []>} : vector<8x16xf32>, vector<16x64xf32>, vector<8x64xf32> -> vector<8x64xf32>
    %121 = arith.addf %120, %4 : vector<8x64xf32>
    %c0_97 = arith.constant 0 : index
    %c0_98 = arith.constant 0 : index
    %c896 = arith.constant 896 : index
    %122 = vector.load %arg6[%c0_97, %c0_98, %c896] : memref<2x8x1024xf32, #tpu.memory_space<vmem>>, vector<1x8x64xf32>
    %123 = vector.shape_cast %122 : vector<1x8x64xf32> to vector<8x64xf32>
    %124 = vector.shape_cast %121 : vector<8x64xf32> to vector<1x8x64xf32>
    tpu.vector_store %arg6[%c0_97, %c0_98, %c896], %124 {strides = array<i32>} : memref<2x8x1024xf32, #tpu.memory_space<vmem>>, vector<1x8x64xf32>,
    %c0_99 = arith.constant 0 : index
    %c0_100 = arith.constant 0 : index
    %c240 = arith.constant 240 : index
    %125 = vector.load %arg2[%c0_99, %c0_100, %c240] : memref<2x4x256xf32, #tpu.memory_space<vmem>>, vector<1x4x16xf32>
    %126 = vector.shape_cast %125 : vector<1x4x16xf32> to vector<4x16xf32>
    %cst_101 = arith.constant dense<0.000000e+00> : vector<8x16xf32>
    %127 = tpu.matmul %0, %126, %cst_101 {dimension_numbers = #tpu.dot_dimension_numbers<[1], [0], [0], [1], [0, 0, 1, 1], [], []>} : vector<8x4xf32>, vector<4x16xf32>, vector<8x16xf32> -> vector<8x16xf32>
    %cst_102 = arith.constant dense<0.000000e+00> : vector<8x64xf32>
    %128 = tpu.matmul %127, %1, %cst_102 {dimension_numbers = #tpu.dot_dimension_numbers<[1], [0], [0], [1], [0, 0, 1, 1], [], []>} : vector<8x16xf32>, vector<16x64xf32>, vector<8x64xf32> -> vector<8x64xf32>
    %129 = arith.addf %128, %4 : vector<8x64xf32>
    %c0_103 = arith.constant 0 : index
    %c0_104 = arith.constant 0 : index
    %c960 = arith.constant 960 : index
    %130 = vector.load %arg6[%c0_103, %c0_104, %c960] : memref<2x8x1024xf32, #tpu.memory_space<vmem>>, vector<1x8x64xf32>
    %131 = vector.shape_cast %130 : vector<1x8x64xf32> to vector<8x64xf32>
    %132 = vector.shape_cast %129 : vector<8x64xf32> to vector<1x8x64xf32>
    tpu.vector_store %arg6[%c0_103, %c0_104, %c960], %132 {strides = array<i32>} : memref<2x8x1024xf32, #tpu.memory_space<vmem>>, vector<1x8x64xf32>,
    %c1 = arith.constant 1 : index
    %c0_105 = arith.constant 0 : index
    %c0_106 = arith.constant 0 : index
    %133 = vector.load %arg2[%c1, %c0_105, %c0_106] : memref<2x4x256xf32, #tpu.memory_space<vmem>>, vector<1x4x16xf32>
    %134 = vector.shape_cast %133 : vector<1x4x16xf32> to vector<4x16xf32>
    %cst_107 = arith.constant dense<0.000000e+00> : vector<8x16xf32>
    %135 = tpu.matmul %0, %134, %cst_107 {dimension_numbers = #tpu.dot_dimension_numbers<[1], [0], [0], [1], [0, 0, 1, 1], [], []>} : vector<8x4xf32>, vector<4x16xf32>, vector<8x16xf32> -> vector<8x16xf32>
    %cst_108 = arith.constant dense<0.000000e+00> : vector<8x64xf32>
    %136 = tpu.matmul %135, %1, %cst_108 {dimension_numbers = #tpu.dot_dimension_numbers<[1], [0], [0], [1], [0, 0, 1, 1], [], []>} : vector<8x16xf32>, vector<16x64xf32>, vector<8x64xf32> -> vector<8x64xf32>
    %137 = arith.addf %136, %4 : vector<8x64xf32>
    %c1_109 = arith.constant 1 : index
    %c0_110 = arith.constant 0 : index
    %c0_111 = arith.constant 0 : index
    %138 = vector.load %arg6[%c1_109, %c0_110, %c0_111] : memref<2x8x1024xf32, #tpu.memory_space<vmem>>, vector<1x8x64xf32>
    %139 = vector.shape_cast %138 : vector<1x8x64xf32> to vector<8x64xf32>
    %140 = vector.shape_cast %137 : vector<8x64xf32> to vector<1x8x64xf32>
    tpu.vector_store %arg6[%c1_109, %c0_110, %c0_111], %140 {strides = array<i32>} : memref<2x8x1024xf32, #tpu.memory_space<vmem>>, vector<1x8x64xf32>,
    %c1_112 = arith.constant 1 : index
    %c0_113 = arith.constant 0 : index
    %c16_114 = arith.constant 16 : index
    %141 = vector.load %arg2[%c1_112, %c0_113, %c16_114] : memref<2x4x256xf32, #tpu.memory_space<vmem>>, vector<1x4x16xf32>
    %142 = vector.shape_cast %141 : vector<1x4x16xf32> to vector<4x16xf32>
    %cst_115 = arith.constant dense<0.000000e+00> : vector<8x16xf32>
    %143 = tpu.matmul %0, %142, %cst_115 {dimension_numbers = #tpu.dot_dimension_numbers<[1], [0], [0], [1], [0, 0, 1, 1], [], []>} : vector<8x4xf32>, vector<4x16xf32>, vector<8x16xf32> -> vector<8x16xf32>
    %cst_116 = arith.constant dense<0.000000e+00> : vector<8x64xf32>
    %144 = tpu.matmul %143, %1, %cst_116 {dimension_numbers = #tpu.dot_dimension_numbers<[1], [0], [0], [1], [0, 0, 1, 1], [], []>} : vector<8x16xf32>, vector<16x64xf32>, vector<8x64xf32> -> vector<8x64xf32>
    %145 = arith.addf %144, %4 : vector<8x64xf32>
    %c1_117 = arith.constant 1 : index
    %c0_118 = arith.constant 0 : index
    %c64_119 = arith.constant 64 : index
    %146 = vector.load %arg6[%c1_117, %c0_118, %c64_119] : memref<2x8x1024xf32, #tpu.memory_space<vmem>>, vector<1x8x64xf32>
    %147 = vector.shape_cast %146 : vector<1x8x64xf32> to vector<8x64xf32>
    %148 = vector.shape_cast %145 : vector<8x64xf32> to vector<1x8x64xf32>
    tpu.vector_store %arg6[%c1_117, %c0_118, %c64_119], %148 {strides = array<i32>} : memref<2x8x1024xf32, #tpu.memory_space<vmem>>, vector<1x8x64xf32>,
    %c1_120 = arith.constant 1 : index
    %c0_121 = arith.constant 0 : index
    %c32_122 = arith.constant 32 : index
    %149 = vector.load %arg2[%c1_120, %c0_121, %c32_122] : memref<2x4x256xf32, #tpu.memory_space<vmem>>, vector<1x4x16xf32>
    %150 = vector.shape_cast %149 : vector<1x4x16xf32> to vector<4x16xf32>
    %cst_123 = arith.constant dense<0.000000e+00> : vector<8x16xf32>
    %151 = tpu.matmul %0, %150, %cst_123 {dimension_numbers = #tpu.dot_dimension_numbers<[1], [0], [0], [1], [0, 0, 1, 1], [], []>} : vector<8x4xf32>, vector<4x16xf32>, vector<8x16xf32> -> vector<8x16xf32>
    %cst_124 = arith.constant dense<0.000000e+00> : vector<8x64xf32>
    %152 = tpu.matmul %151, %1, %cst_124 {dimension_numbers = #tpu.dot_dimension_numbers<[1], [0], [0], [1], [0, 0, 1, 1], [], []>} : vector<8x16xf32>, vector<16x64xf32>, vector<8x64xf32> -> vector<8x64xf32>
    %153 = arith.addf %152, %4 : vector<8x64xf32>
    %c1_125 = arith.constant 1 : index
    %c0_126 = arith.constant 0 : index
    %c128_127 = arith.constant 128 : index
    %154 = vector.load %arg6[%c1_125, %c0_126, %c128_127] : memref<2x8x1024xf32, #tpu.memory_space<vmem>>, vector<1x8x64xf32>
    %155 = vector.shape_cast %154 : vector<1x8x64xf32> to vector<8x64xf32>
    %156 = vector.shape_cast %153 : vector<8x64xf32> to vector<1x8x64xf32>
    tpu.vector_store %arg6[%c1_125, %c0_126, %c128_127], %156 {strides = array<i32>} : memref<2x8x1024xf32, #tpu.memory_space<vmem>>, vector<1x8x64xf32>,
    %c1_128 = arith.constant 1 : index
    %c0_129 = arith.constant 0 : index
    %c48_130 = arith.constant 48 : index
    %157 = vector.load %arg2[%c1_128, %c0_129, %c48_130] : memref<2x4x256xf32, #tpu.memory_space<vmem>>, vector<1x4x16xf32>
    %158 = vector.shape_cast %157 : vector<1x4x16xf32> to vector<4x16xf32>
    %cst_131 = arith.constant dense<0.000000e+00> : vector<8x16xf32>
    %159 = tpu.matmul %0, %158, %cst_131 {dimension_numbers = #tpu.dot_dimension_numbers<[1], [0], [0], [1], [0, 0, 1, 1], [], []>} : vector<8x4xf32>, vector<4x16xf32>, vector<8x16xf32> -> vector<8x16xf32>
    %cst_132 = arith.constant dense<0.000000e+00> : vector<8x64xf32>
    %160 = tpu.matmul %159, %1, %cst_132 {dimension_numbers = #tpu.dot_dimension_numbers<[1], [0], [0], [1], [0, 0, 1, 1], [], []>} : vector<8x16xf32>, vector<16x64xf32>, vector<8x64xf32> -> vector<8x64xf32>
    %161 = arith.addf %160, %4 : vector<8x64xf32>
    %c1_133 = arith.constant 1 : index
    %c0_134 = arith.constant 0 : index
    %c192_135 = arith.constant 192 : index
    %162 = vector.load %arg6[%c1_133, %c0_134, %c192_135] : memref<2x8x1024xf32, #tpu.memory_space<vmem>>, vector<1x8x64xf32>
    %163 = vector.shape_cast %162 : vector<1x8x64xf32> to vector<8x64xf32>
    %164 = vector.shape_cast %161 : vector<8x64xf32> to vector<1x8x64xf32>
    tpu.vector_store %arg6[%c1_133, %c0_134, %c192_135], %164 {strides = array<i32>} : memref<2x8x1024xf32, #tpu.memory_space<vmem>>, vector<1x8x64xf32>,
    %c1_136 = arith.constant 1 : index
    %c0_137 = arith.constant 0 : index
    %c64_138 = arith.constant 64 : index
    %165 = vector.load %arg2[%c1_136, %c0_137, %c64_138] : memref<2x4x256xf32, #tpu.memory_space<vmem>>, vector<1x4x16xf32>
    %166 = vector.shape_cast %165 : vector<1x4x16xf32> to vector<4x16xf32>
    %cst_139 = arith.constant dense<0.000000e+00> : vector<8x16xf32>
    %167 = tpu.matmul %0, %166, %cst_139 {dimension_numbers = #tpu.dot_dimension_numbers<[1], [0], [0], [1], [0, 0, 1, 1], [], []>} : vector<8x4xf32>, vector<4x16xf32>, vector<8x16xf32> -> vector<8x16xf32>
    %cst_140 = arith.constant dense<0.000000e+00> : vector<8x64xf32>
    %168 = tpu.matmul %167, %1, %cst_140 {dimension_numbers = #tpu.dot_dimension_numbers<[1], [0], [0], [1], [0, 0, 1, 1], [], []>} : vector<8x16xf32>, vector<16x64xf32>, vector<8x64xf32> -> vector<8x64xf32>
    %169 = arith.addf %168, %4 : vector<8x64xf32>
    %c1_141 = arith.constant 1 : index
    %c0_142 = arith.constant 0 : index
    %c256_143 = arith.constant 256 : index
    %170 = vector.load %arg6[%c1_141, %c0_142, %c256_143] : memref<2x8x1024xf32, #tpu.memory_space<vmem>>, vector<1x8x64xf32>
    %171 = vector.shape_cast %170 : vector<1x8x64xf32> to vector<8x64xf32>
    %172 = vector.shape_cast %169 : vector<8x64xf32> to vector<1x8x64xf32>
    tpu.vector_store %arg6[%c1_141, %c0_142, %c256_143], %172 {strides = array<i32>} : memref<2x8x1024xf32, #tpu.memory_space<vmem>>, vector<1x8x64xf32>,
    %c1_144 = arith.constant 1 : index
    %c0_145 = arith.constant 0 : index
    %c80_146 = arith.constant 80 : index
    %173 = vector.load %arg2[%c1_144, %c0_145, %c80_146] : memref<2x4x256xf32, #tpu.memory_space<vmem>>, vector<1x4x16xf32>
    %174 = vector.shape_cast %173 : vector<1x4x16xf32> to vector<4x16xf32>
    %cst_147 = arith.constant dense<0.000000e+00> : vector<8x16xf32>
    %175 = tpu.matmul %0, %174, %cst_147 {dimension_numbers = #tpu.dot_dimension_numbers<[1], [0], [0], [1], [0, 0, 1, 1], [], []>} : vector<8x4xf32>, vector<4x16xf32>, vector<8x16xf32> -> vector<8x16xf32>
    %cst_148 = arith.constant dense<0.000000e+00> : vector<8x64xf32>
    %176 = tpu.matmul %175, %1, %cst_148 {dimension_numbers = #tpu.dot_dimension_numbers<[1], [0], [0], [1], [0, 0, 1, 1], [], []>} : vector<8x16xf32>, vector<16x64xf32>, vector<8x64xf32> -> vector<8x64xf32>
    %177 = arith.addf %176, %4 : vector<8x64xf32>
    %c1_149 = arith.constant 1 : index
    %c0_150 = arith.constant 0 : index
    %c320_151 = arith.constant 320 : index
    %178 = vector.load %arg6[%c1_149, %c0_150, %c320_151] : memref<2x8x1024xf32, #tpu.memory_space<vmem>>, vector<1x8x64xf32>
    %179 = vector.shape_cast %178 : vector<1x8x64xf32> to vector<8x64xf32>
    %180 = vector.shape_cast %177 : vector<8x64xf32> to vector<1x8x64xf32>
    tpu.vector_store %arg6[%c1_149, %c0_150, %c320_151], %180 {strides = array<i32>} : memref<2x8x1024xf32, #tpu.memory_space<vmem>>, vector<1x8x64xf32>,
    %c1_152 = arith.constant 1 : index
    %c0_153 = arith.constant 0 : index
    %c96_154 = arith.constant 96 : index
    %181 = vector.load %arg2[%c1_152, %c0_153, %c96_154] : memref<2x4x256xf32, #tpu.memory_space<vmem>>, vector<1x4x16xf32>
    %182 = vector.shape_cast %181 : vector<1x4x16xf32> to vector<4x16xf32>
    %cst_155 = arith.constant dense<0.000000e+00> : vector<8x16xf32>
    %183 = tpu.matmul %0, %182, %cst_155 {dimension_numbers = #tpu.dot_dimension_numbers<[1], [0], [0], [1], [0, 0, 1, 1], [], []>} : vector<8x4xf32>, vector<4x16xf32>, vector<8x16xf32> -> vector<8x16xf32>
    %cst_156 = arith.constant dense<0.000000e+00> : vector<8x64xf32>
    %184 = tpu.matmul %183, %1, %cst_156 {dimension_numbers = #tpu.dot_dimension_numbers<[1], [0], [0], [1], [0, 0, 1, 1], [], []>} : vector<8x16xf32>, vector<16x64xf32>, vector<8x64xf32> -> vector<8x64xf32>
    %185 = arith.addf %184, %4 : vector<8x64xf32>
    %c1_157 = arith.constant 1 : index
    %c0_158 = arith.constant 0 : index
    %c384_159 = arith.constant 384 : index
    %186 = vector.load %arg6[%c1_157, %c0_158, %c384_159] : memref<2x8x1024xf32, #tpu.memory_space<vmem>>, vector<1x8x64xf32>
    %187 = vector.shape_cast %186 : vector<1x8x64xf32> to vector<8x64xf32>
    %188 = vector.shape_cast %185 : vector<8x64xf32> to vector<1x8x64xf32>
    tpu.vector_store %arg6[%c1_157, %c0_158, %c384_159], %188 {strides = array<i32>} : memref<2x8x1024xf32, #tpu.memory_space<vmem>>, vector<1x8x64xf32>,
    %c1_160 = arith.constant 1 : index
    %c0_161 = arith.constant 0 : index
    %c112_162 = arith.constant 112 : index
    %189 = vector.load %arg2[%c1_160, %c0_161, %c112_162] : memref<2x4x256xf32, #tpu.memory_space<vmem>>, vector<1x4x16xf32>
    %190 = vector.shape_cast %189 : vector<1x4x16xf32> to vector<4x16xf32>
    %cst_163 = arith.constant dense<0.000000e+00> : vector<8x16xf32>
    %191 = tpu.matmul %0, %190, %cst_163 {dimension_numbers = #tpu.dot_dimension_numbers<[1], [0], [0], [1], [0, 0, 1, 1], [], []>} : vector<8x4xf32>, vector<4x16xf32>, vector<8x16xf32> -> vector<8x16xf32>
    %cst_164 = arith.constant dense<0.000000e+00> : vector<8x64xf32>
    %192 = tpu.matmul %191, %1, %cst_164 {dimension_numbers = #tpu.dot_dimension_numbers<[1], [0], [0], [1], [0, 0, 1, 1], [], []>} : vector<8x16xf32>, vector<16x64xf32>, vector<8x64xf32> -> vector<8x64xf32>
    %193 = arith.addf %192, %4 : vector<8x64xf32>
    %c1_165 = arith.constant 1 : index
    %c0_166 = arith.constant 0 : index
    %c448_167 = arith.constant 448 : index
    %194 = vector.load %arg6[%c1_165, %c0_166, %c448_167] : memref<2x8x1024xf32, #tpu.memory_space<vmem>>, vector<1x8x64xf32>
    %195 = vector.shape_cast %194 : vector<1x8x64xf32> to vector<8x64xf32>
    %196 = vector.shape_cast %193 : vector<8x64xf32> to vector<1x8x64xf32>
    tpu.vector_store %arg6[%c1_165, %c0_166, %c448_167], %196 {strides = array<i32>} : memref<2x8x1024xf32, #tpu.memory_space<vmem>>, vector<1x8x64xf32>,
    %c1_168 = arith.constant 1 : index
    %c0_169 = arith.constant 0 : index
    %c128_170 = arith.constant 128 : index
    %197 = vector.load %arg2[%c1_168, %c0_169, %c128_170] : memref<2x4x256xf32, #tpu.memory_space<vmem>>, vector<1x4x16xf32>
    %198 = vector.shape_cast %197 : vector<1x4x16xf32> to vector<4x16xf32>
    %cst_171 = arith.constant dense<0.000000e+00> : vector<8x16xf32>
    %199 = tpu.matmul %0, %198, %cst_171 {dimension_numbers = #tpu.dot_dimension_numbers<[1], [0], [0], [1], [0, 0, 1, 1], [], []>} : vector<8x4xf32>, vector<4x16xf32>, vector<8x16xf32> -> vector<8x16xf32>
    %cst_172 = arith.constant dense<0.000000e+00> : vector<8x64xf32>
    %200 = tpu.matmul %199, %1, %cst_172 {dimension_numbers = #tpu.dot_dimension_numbers<[1], [0], [0], [1], [0, 0, 1, 1], [], []>} : vector<8x16xf32>, vector<16x64xf32>, vector<8x64xf32> -> vector<8x64xf32>
    %201 = arith.addf %200, %4 : vector<8x64xf32>
    %c1_173 = arith.constant 1 : index
    %c0_174 = arith.constant 0 : index
    %c512_175 = arith.constant 512 : index
    %202 = vector.load %arg6[%c1_173, %c0_174, %c512_175] : memref<2x8x1024xf32, #tpu.memory_space<vmem>>, vector<1x8x64xf32>
    %203 = vector.shape_cast %202 : vector<1x8x64xf32> to vector<8x64xf32>
    %204 = vector.shape_cast %201 : vector<8x64xf32> to vector<1x8x64xf32>
    tpu.vector_store %arg6[%c1_173, %c0_174, %c512_175], %204 {strides = array<i32>} : memref<2x8x1024xf32, #tpu.memory_space<vmem>>, vector<1x8x64xf32>,
    %c1_176 = arith.constant 1 : index
    %c0_177 = arith.constant 0 : index
    %c144_178 = arith.constant 144 : index
    %205 = vector.load %arg2[%c1_176, %c0_177, %c144_178] : memref<2x4x256xf32, #tpu.memory_space<vmem>>, vector<1x4x16xf32>
    %206 = vector.shape_cast %205 : vector<1x4x16xf32> to vector<4x16xf32>
    %cst_179 = arith.constant dense<0.000000e+00> : vector<8x16xf32>
    %207 = tpu.matmul %0, %206, %cst_179 {dimension_numbers = #tpu.dot_dimension_numbers<[1], [0], [0], [1], [0, 0, 1, 1], [], []>} : vector<8x4xf32>, vector<4x16xf32>, vector<8x16xf32> -> vector<8x16xf32>
    %cst_180 = arith.constant dense<0.000000e+00> : vector<8x64xf32>
    %208 = tpu.matmul %207, %1, %cst_180 {dimension_numbers = #tpu.dot_dimension_numbers<[1], [0], [0], [1], [0, 0, 1, 1], [], []>} : vector<8x16xf32>, vector<16x64xf32>, vector<8x64xf32> -> vector<8x64xf32>
    %209 = arith.addf %208, %4 : vector<8x64xf32>
    %c1_181 = arith.constant 1 : index
    %c0_182 = arith.constant 0 : index
    %c576_183 = arith.constant 576 : index
    %210 = vector.load %arg6[%c1_181, %c0_182, %c576_183] : memref<2x8x1024xf32, #tpu.memory_space<vmem>>, vector<1x8x64xf32>
    %211 = vector.shape_cast %210 : vector<1x8x64xf32> to vector<8x64xf32>
    %212 = vector.shape_cast %209 : vector<8x64xf32> to vector<1x8x64xf32>
    tpu.vector_store %arg6[%c1_181, %c0_182, %c576_183], %212 {strides = array<i32>} : memref<2x8x1024xf32, #tpu.memory_space<vmem>>, vector<1x8x64xf32>,
    %c1_184 = arith.constant 1 : index
    %c0_185 = arith.constant 0 : index
    %c160_186 = arith.constant 160 : index
    %213 = vector.load %arg2[%c1_184, %c0_185, %c160_186] : memref<2x4x256xf32, #tpu.memory_space<vmem>>, vector<1x4x16xf32>
    %214 = vector.shape_cast %213 : vector<1x4x16xf32> to vector<4x16xf32>
    %cst_187 = arith.constant dense<0.000000e+00> : vector<8x16xf32>
    %215 = tpu.matmul %0, %214, %cst_187 {dimension_numbers = #tpu.dot_dimension_numbers<[1], [0], [0], [1], [0, 0, 1, 1], [], []>} : vector<8x4xf32>, vector<4x16xf32>, vector<8x16xf32> -> vector<8x16xf32>
    %cst_188 = arith.constant dense<0.000000e+00> : vector<8x64xf32>
    %216 = tpu.matmul %215, %1, %cst_188 {dimension_numbers = #tpu.dot_dimension_numbers<[1], [0], [0], [1], [0, 0, 1, 1], [], []>} : vector<8x16xf32>, vector<16x64xf32>, vector<8x64xf32> -> vector<8x64xf32>
    %217 = arith.addf %216, %4 : vector<8x64xf32>
    %c1_189 = arith.constant 1 : index
    %c0_190 = arith.constant 0 : index
    %c640_191 = arith.constant 640 : index
    %218 = vector.load %arg6[%c1_189, %c0_190, %c640_191] : memref<2x8x1024xf32, #tpu.memory_space<vmem>>, vector<1x8x64xf32>
    %219 = vector.shape_cast %218 : vector<1x8x64xf32> to vector<8x64xf32>
    %220 = vector.shape_cast %217 : vector<8x64xf32> to vector<1x8x64xf32>
    tpu.vector_store %arg6[%c1_189, %c0_190, %c640_191], %220 {strides = array<i32>} : memref<2x8x1024xf32, #tpu.memory_space<vmem>>, vector<1x8x64xf32>,
    %c1_192 = arith.constant 1 : index
    %c0_193 = arith.constant 0 : index
    %c176_194 = arith.constant 176 : index
    %221 = vector.load %arg2[%c1_192, %c0_193, %c176_194] : memref<2x4x256xf32, #tpu.memory_space<vmem>>, vector<1x4x16xf32>
    %222 = vector.shape_cast %221 : vector<1x4x16xf32> to vector<4x16xf32>
    %cst_195 = arith.constant dense<0.000000e+00> : vector<8x16xf32>
    %223 = tpu.matmul %0, %222, %cst_195 {dimension_numbers = #tpu.dot_dimension_numbers<[1], [0], [0], [1], [0, 0, 1, 1], [], []>} : vector<8x4xf32>, vector<4x16xf32>, vector<8x16xf32> -> vector<8x16xf32>
    %cst_196 = arith.constant dense<0.000000e+00> : vector<8x64xf32>
    %224 = tpu.matmul %223, %1, %cst_196 {dimension_numbers = #tpu.dot_dimension_numbers<[1], [0], [0], [1], [0, 0, 1, 1], [], []>} : vector<8x16xf32>, vector<16x64xf32>, vector<8x64xf32> -> vector<8x64xf32>
    %225 = arith.addf %224, %4 : vector<8x64xf32>
    %c1_197 = arith.constant 1 : index
    %c0_198 = arith.constant 0 : index
    %c704_199 = arith.constant 704 : index
    %226 = vector.load %arg6[%c1_197, %c0_198, %c704_199] : memref<2x8x1024xf32, #tpu.memory_space<vmem>>, vector<1x8x64xf32>
    %227 = vector.shape_cast %226 : vector<1x8x64xf32> to vector<8x64xf32>
    %228 = vector.shape_cast %225 : vector<8x64xf32> to vector<1x8x64xf32>
    tpu.vector_store %arg6[%c1_197, %c0_198, %c704_199], %228 {strides = array<i32>} : memref<2x8x1024xf32, #tpu.memory_space<vmem>>, vector<1x8x64xf32>,
    %c1_200 = arith.constant 1 : index
    %c0_201 = arith.constant 0 : index
    %c192_202 = arith.constant 192 : index
    %229 = vector.load %arg2[%c1_200, %c0_201, %c192_202] : memref<2x4x256xf32, #tpu.memory_space<vmem>>, vector<1x4x16xf32>
    %230 = vector.shape_cast %229 : vector<1x4x16xf32> to vector<4x16xf32>
    %cst_203 = arith.constant dense<0.000000e+00> : vector<8x16xf32>
    %231 = tpu.matmul %0, %230, %cst_203 {dimension_numbers = #tpu.dot_dimension_numbers<[1], [0], [0], [1], [0, 0, 1, 1], [], []>} : vector<8x4xf32>, vector<4x16xf32>, vector<8x16xf32> -> vector<8x16xf32>
    %cst_204 = arith.constant dense<0.000000e+00> : vector<8x64xf32>
    %232 = tpu.matmul %231, %1, %cst_204 {dimension_numbers = #tpu.dot_dimension_numbers<[1], [0], [0], [1], [0, 0, 1, 1], [], []>} : vector<8x16xf32>, vector<16x64xf32>, vector<8x64xf32> -> vector<8x64xf32>
    %233 = arith.addf %232, %4 : vector<8x64xf32>
    %c1_205 = arith.constant 1 : index
    %c0_206 = arith.constant 0 : index
    %c768_207 = arith.constant 768 : index
    %234 = vector.load %arg6[%c1_205, %c0_206, %c768_207] : memref<2x8x1024xf32, #tpu.memory_space<vmem>>, vector<1x8x64xf32>
    %235 = vector.shape_cast %234 : vector<1x8x64xf32> to vector<8x64xf32>
    %236 = vector.shape_cast %233 : vector<8x64xf32> to vector<1x8x64xf32>
    tpu.vector_store %arg6[%c1_205, %c0_206, %c768_207], %236 {strides = array<i32>} : memref<2x8x1024xf32, #tpu.memory_space<vmem>>, vector<1x8x64xf32>,
    %c1_208 = arith.constant 1 : index
    %c0_209 = arith.constant 0 : index
    %c208_210 = arith.constant 208 : index
    %237 = vector.load %arg2[%c1_208, %c0_209, %c208_210] : memref<2x4x256xf32, #tpu.memory_space<vmem>>, vector<1x4x16xf32>
    %238 = vector.shape_cast %237 : vector<1x4x16xf32> to vector<4x16xf32>
    %cst_211 = arith.constant dense<0.000000e+00> : vector<8x16xf32>
    %239 = tpu.matmul %0, %238, %cst_211 {dimension_numbers = #tpu.dot_dimension_numbers<[1], [0], [0], [1], [0, 0, 1, 1], [], []>} : vector<8x4xf32>, vector<4x16xf32>, vector<8x16xf32> -> vector<8x16xf32>
    %cst_212 = arith.constant dense<0.000000e+00> : vector<8x64xf32>
    %240 = tpu.matmul %239, %1, %cst_212 {dimension_numbers = #tpu.dot_dimension_numbers<[1], [0], [0], [1], [0, 0, 1, 1], [], []>} : vector<8x16xf32>, vector<16x64xf32>, vector<8x64xf32> -> vector<8x64xf32>
    %241 = arith.addf %240, %4 : vector<8x64xf32>
    %c1_213 = arith.constant 1 : index
    %c0_214 = arith.constant 0 : index
    %c832_215 = arith.constant 832 : index
    %242 = vector.load %arg6[%c1_213, %c0_214, %c832_215] : memref<2x8x1024xf32, #tpu.memory_space<vmem>>, vector<1x8x64xf32>
    %243 = vector.shape_cast %242 : vector<1x8x64xf32> to vector<8x64xf32>
    %244 = vector.shape_cast %241 : vector<8x64xf32> to vector<1x8x64xf32>
    tpu.vector_store %arg6[%c1_213, %c0_214, %c832_215], %244 {strides = array<i32>} : memref<2x8x1024xf32, #tpu.memory_space<vmem>>, vector<1x8x64xf32>,
    %c1_216 = arith.constant 1 : index
    %c0_217 = arith.constant 0 : index
    %c224_218 = arith.constant 224 : index
    %245 = vector.load %arg2[%c1_216, %c0_217, %c224_218] : memref<2x4x256xf32, #tpu.memory_space<vmem>>, vector<1x4x16xf32>
    %246 = vector.shape_cast %245 : vector<1x4x16xf32> to vector<4x16xf32>
    %cst_219 = arith.constant dense<0.000000e+00> : vector<8x16xf32>
    %247 = tpu.matmul %0, %246, %cst_219 {dimension_numbers = #tpu.dot_dimension_numbers<[1], [0], [0], [1], [0, 0, 1, 1], [], []>} : vector<8x4xf32>, vector<4x16xf32>, vector<8x16xf32> -> vector<8x16xf32>
    %cst_220 = arith.constant dense<0.000000e+00> : vector<8x64xf32>
    %248 = tpu.matmul %247, %1, %cst_220 {dimension_numbers = #tpu.dot_dimension_numbers<[1], [0], [0], [1], [0, 0, 1, 1], [], []>} : vector<8x16xf32>, vector<16x64xf32>, vector<8x64xf32> -> vector<8x64xf32>
    %249 = arith.addf %248, %4 : vector<8x64xf32>
    %c1_221 = arith.constant 1 : index
    %c0_222 = arith.constant 0 : index
    %c896_223 = arith.constant 896 : index
    %250 = vector.load %arg6[%c1_221, %c0_222, %c896_223] : memref<2x8x1024xf32, #tpu.memory_space<vmem>>, vector<1x8x64xf32>
    %251 = vector.shape_cast %250 : vector<1x8x64xf32> to vector<8x64xf32>
    %252 = vector.shape_cast %249 : vector<8x64xf32> to vector<1x8x64xf32>
    tpu.vector_store %arg6[%c1_221, %c0_222, %c896_223], %252 {strides = array<i32>} : memref<2x8x1024xf32, #tpu.memory_space<vmem>>, vector<1x8x64xf32>,
    %c1_224 = arith.constant 1 : index
    %c0_225 = arith.constant 0 : index
    %c240_226 = arith.constant 240 : index
    %253 = vector.load %arg2[%c1_224, %c0_225, %c240_226] : memref<2x4x256xf32, #tpu.memory_space<vmem>>, vector<1x4x16xf32>
    %254 = vector.shape_cast %253 : vector<1x4x16xf32> to vector<4x16xf32>
    %cst_227 = arith.constant dense<0.000000e+00> : vector<8x16xf32>
    %255 = tpu.matmul %0, %254, %cst_227 {dimension_numbers = #tpu.dot_dimension_numbers<[1], [0], [0], [1], [0, 0, 1, 1], [], []>} : vector<8x4xf32>, vector<4x16xf32>, vector<8x16xf32> -> vector<8x16xf32>
    %cst_228 = arith.constant dense<0.000000e+00> : vector<8x64xf32>
    %256 = tpu.matmul %255, %1, %cst_228 {dimension_numbers = #tpu.dot_dimension_numbers<[1], [0], [0], [1], [0, 0, 1, 1], [], []>} : vector<8x16xf32>, vector<16x64xf32>, vector<8x64xf32> -> vector<8x64xf32>
    %257 = arith.addf %256, %4 : vector<8x64xf32>
    %c1_229 = arith.constant 1 : index
    %c0_230 = arith.constant 0 : index
    %c960_231 = arith.constant 960 : index
    %258 = vector.load %arg6[%c1_229, %c0_230, %c960_231] : memref<2x8x1024xf32, #tpu.memory_space<vmem>>, vector<1x8x64xf32>
    %259 = vector.shape_cast %258 : vector<1x8x64xf32> to vector<8x64xf32>
    %260 = vector.shape_cast %257 : vector<8x64xf32> to vector<1x8x64xf32>
    tpu.vector_store %arg6[%c1_229, %c0_230, %c960_231], %260 {strides = array<i32>} : memref<2x8x1024xf32, #tpu.memory_space<vmem>>, vector<1x8x64xf32>,
    return
  }
  func.func @transform_0(%arg0: i32, %arg1: i32) -> (i32, i32, i32) {
    %c0_i32 = arith.constant 0 : i32
    %c0_i32_0 = arith.constant 0 : i32
    return %arg0, %c0_i32, %arg1 : i32, i32, i32
  }
  func.func @transform_1(%arg0: i32, %arg1: i32) -> (i32, i32) {
    %c0_i32 = arith.constant 0 : i32
    %c0_i32_0 = arith.constant 0 : i32
    %c0_i32_1 = arith.constant 0 : i32
    return %c0_i32, %c0_i32_0 : i32, i32
  }
  func.func @transform_2(%arg0: i32, %arg1: i32) -> (i32, i32) {
    %c0_i32 = arith.constant 0 : i32
    %c0_i32_0 = arith.constant 0 : i32
    %c0_i32_1 = arith.constant 0 : i32
    return %c0_i32, %c0_i32_0 : i32, i32
  }
  func.func @transform_3(%arg0: i32, %arg1: i32) -> (i32, i32) {
    %c0_i32 = arith.constant 0 : i32
    %c0_i32_0 = arith.constant 0 : i32
    %c0_i32_1 = arith.constant 0 : i32
    return %c0_i32, %c0_i32_0 : i32, i32
  }
  func.func @transform_4(%arg0: i32, %arg1: i32) -> (i32, i32, i32) {
    %c0_i32 = arith.constant 0 : i32
    %c0_i32_0 = arith.constant 0 : i32
    return %arg0, %c0_i32, %arg1 : i32, i32, i32
  }
}

</mosaic_0001>

<bundles_post_ra>
// kernel: tpu_custom_call.1
= control target key start
LH: loop header
LB: loop body
LE: loop exit
PB: predicated region body
PF: predicated region fallthrough
CT: control target
= control target key end

     0   :  { %9 = vsyncpa [#allocation3], 0  ;;  %s2424_s0 = inlined_call_operand.vmem [shape: f32[2,4,256], index: 0, kind: input, shape index: {}]   ;;  %s2425_s1 = inlined_call_operand.vmem [shape: f32[8,4], index: 1, kind: input, shape index: {}]   ;;  %s2426_s2 = inlined_call_operand.hbm [shape: f32[16,64], index: 2, kind: input, shape index: {}]   ;;  %s2427_s3 = inlined_call_operand.vmem [shape: f32[8,1], index: 3, kind: input, shape index: {}]   ;;  %s2428_s4 = inlined_call_operand.hbm [shape: f32[2,8,1024], index: 4, kind: output, shape index: {}]  }
   0x1   :  { %10 = vsyncpa [#allocation4], 0  ;;  %s19_s17 = sshll.u32 %s2426_s2, 4  ;;  %s1963_s18 = smov [#allocation2]   ;;  %s20_s17 = int_to_ptr.hbm [resolvable:$true] %s19_s17 }
   0x2   :  { %s21_s19 = sshll.u32 %s1963_s18, 4  ;;  %s1964_s20 = smov 128   ;;  %s22_s19 = int_to_ptr.vmem [resolvable:$true] %s21_s19 }
   0x3   :  { %s1965_s21 = smov 8  }
   0x4   :  { %27 = dma.hbm_to_vmem [thread:$0]  %s20_s17, 256, %s22_s19, [#allocation3], %s1964_s20, %s1964_s20, %s1965_s21  }
   0x5   :  { %1959 = dma.done.wait [#allocation3], 256  }
   0x6   :  { %1960 = vsyncadd [#allocation3], 4294967040  ;;  %vm48_vm0 = vcmask 1043456   ;;  %vm44_vm1 = vcmask 31744   ;;  %v43_v0 = vld [vmem:[%s2424_s0] sm:$0xf] }
   0x7   :  { %v2010_v1 = vld [vmem:[%s2425_s1] sm:$0xff]  ;;  %1784 = vmatpush.msk.msra.mxu0 %vm48_vm0, %v43_v0  ;;  %s1966_s29 = smov 112   ;;  %s1967_s7 = smov 80   ;;  %v1836_v29 = vld [vmem:[%s2424_s0 + $0x8] sm:$0xf]  ;;  %v2102_v44 = vld [vmem:[#allocation2 + $0x8] sm:$0xff] }
   0x8   :  { %v98_v2 = vld [vmem:[%s2424_s0] sm:$0xf]  ;;  %1785 = vmatmul.msk.f32.vlgmr.msra.gmra.mxu0 %vm44_vm1, %v2010_v1  ;;  %s1968_s10 = smov 96   ;;  %s1969_s13 = smov 48   ;;  %v527_v15 = vld [vmem:[%s2424_s0 + $0x4] sm:$0xf]  ;;  %90 = vmatpush.msra.mxu1 %v2102_v44 }
   0x9   :  { %100 = vst [vmem:[#allocation1] ss:$2 sm:$0xff] %v98_v2  ;;  %v155_v3 = vld [vmem:[%s2424_s0] sm:$0xf]  ;;  %s1970_s18 = smov 16   ;;  %s1971_s26 = smov 64   ;;  %143 = vmatpush.msra.mxu3 %v2102_v44 }
   0xa   :  { %v207_v5 = vld [vmem:[%s2424_s0] sm:$0xf]  ;;  %v583_v17 = vld [vmem:[%s2424_s0 + $0x4] sm:$0xf]  ;;  %s1972_s5 = smov 32   ;;  %v2106_v45 = vld [vmem:[#allocation2] sm:$0xff] }
   0xb   :  { %v263_v7 = vld [vmem:[%s2424_s0] sm:$0xf]  ;;  %v635_v19 = vld [vmem:[%s2424_s0 + $0x4] sm:$0xf]  ;;  %v1840_v31 = vld [vmem:[%s2424_s0 + $0x8] sm:$0xf]  ;;  %91 = vmatpush.msra.mxu1 %v2106_v45  ;;  %144 = vmatpush.msra.mxu3 %v2106_v45 }
   0xc   :  { %v315_v9 = vld [vmem:[%s2424_s0] sm:$0xf]  ;;  %v691_v21 = vld [vmem:[%s2424_s0 + $0x4] sm:$0xf]  ;;  %v1844_v33 = vld [vmem:[%s2424_s0 + $0x8] sm:$0xf] }
   0xd   :  { %v371_v11 = vld [vmem:[%s2424_s0] sm:$0xf]  ;;  %v743_v23 = vld [vmem:[%s2424_s0 + $0x4] sm:$0xf]  ;;  %v1848_v35 = vld [vmem:[%s2424_s0 + $0x8] sm:$0xf]  ;;  %252 = vmatpush.msrb.mxu3 %v2102_v44 }
   0xe   :  { %v423_v13 = vld [vmem:[%s2424_s0] sm:$0xf]  ;;  %v799_v25 = vld [vmem:[%s2424_s0 + $0x4] sm:$0xf]  ;;  %v1852_v37 = vld [vmem:[%s2424_s0 + $0x8] sm:$0xf] }
   0xf   :  { %v851_v27 = vld [vmem:[%s2424_s0 + $0x4] sm:$0xf]  ;;  %v1856_v39 = vld [vmem:[%s2424_s0 + $0x8] sm:$0xf]  ;;  %vm72_vm2 = vcmask 130048   ;;  %253 = vmatpush.msrb.mxu3 %v2106_v45  ;;  %v1973_v57 = vmov 0  }
  0x10   :  { %v101_v4 = vld.sshfl [vmem:[#allocation1] sm:$0xff pattern:$0x75316420]  ;;  %v1860_v42 = vld [vmem:[%s2424_s0 + $0x8] sm:$0xf]  ;;  %1909 = vset.pattern.permute.xlu1 %v1973_v57  ;;  %1910 = vset.pattern.permute.xlu0 %v1973_v57  ;;  %vm96_vm3 = vcmask 523264  }
  0x11   :  { %102 = vrot.lane.b32.xlu0 %v101_v4, %s1966_s29  ;;  %157 = vst [vmem:[#allocation1] ss:$2 sm:$0xff] %v155_v3  ;;  %v1868_v47 = vld [vmem:[%s2424_s0 + $0xc] sm:$0xf]  ;;  %vm153_vm4 = vcmask 1048064   ;;  %s1771_s21 = sshll.u32 %s2428_s4, 4  ;;  %s1772_s21 = int_to_ptr.hbm [resolvable:$true] %s1771_s21 }
  0x12   :  { %v1872_v50 = vld [vmem:[%s2424_s0 + $0xc] sm:$0xf]  ;;  %s1975_s22 = smov 1024  }
  0x13   :  { %v1876_v53 = vld [vmem:[%s2424_s0 + $0xc] sm:$0xf] }
  0x14   :  { %v1880_v59 = vld [vmem:[%s2424_s0 + $0xc] sm:$0xf] }
  0x15   :  { %v1884_v62 = vld [vmem:[%s2424_s0 + $0xc] sm:$0xf] }
  0x16   :  { %v1888_v2 = vld [vmem:[%s2424_s0 + $0xc] sm:$0xf] }
  0x18   :  { %v158_v6 = vld.sshfl [vmem:[#allocation1] sm:$0xff pattern:$0x75316420] }
  0x19   :  { %209 = vst [vmem:[#allocation1] ss:$2 sm:$0xff] %v207_v5  ;;  %v37_v5 = vld [vmem:[%s2427_s3] sm:$0xff] }
  0x20   :  { %v210_v8 = vld.sshfl [vmem:[#allocation1] sm:$0xff pattern:$0x75316420] }
  0x21   :  { %211 = vrot.lane.b32.xlu0 %v210_v8, %s1967_s7  ;;  %265 = vst [vmem:[#allocation1] ss:$2 sm:$0xff] %v263_v7 }
  0x28   :  { %v266_v10 = vld.sshfl [vmem:[#allocation1] sm:$0xff pattern:$0x75316420] }
  0x29   :  { %317 = vst [vmem:[#allocation1] ss:$2 sm:$0xff] %v315_v9  ;;  %159 = vrot.lane.b32.xlu0 %v158_v6, %s1968_s10  ;;  %v1892_v6 = vld [vmem:[%s2424_s0 + $0xc] sm:$0xf]  ;;  %v479_v9 = vld [vmem:[%s2424_s0 + $0x4] sm:$0xf] }
  0x30   :  { %v318_v12 = vld.sshfl [vmem:[#allocation1] sm:$0xff pattern:$0x75316420] }
  0x31   :  { %319 = vrot.lane.b32.xlu1 %v318_v12, %s1969_s13  ;;  %373 = vst [vmem:[#allocation1] ss:$2 sm:$0xff] %v371_v11 }
  0x38   :  { %v374_v14 = vld.sshfl [vmem:[#allocation1] sm:$0xff pattern:$0x75316420] }
  0x39   :  { %425 = vst [vmem:[#allocation1] ss:$2 sm:$0xff] %v423_v13 }
  0x40   :  { %v426_v16 = vld.sshfl [vmem:[#allocation1] sm:$0xff pattern:$0x75316420] }
  0x41   :  { %427 = vrot.lane.b32.xlu1 %v426_v16, %s1970_s18  ;;  %529 = vst [vmem:[#allocation1] ss:$2 sm:$0xff] %v527_v15 }
  0x48   :  { %v530_v18 = vld.sshfl [vmem:[#allocation1] sm:$0xff pattern:$0x75316420] }
  0x49   :  { %585 = vst [vmem:[#allocation1] ss:$2 sm:$0xff] %v583_v17  ;;  %531 = vrot.lane.b32.xlu2 %v530_v18, %s1966_s29  ;;  %v1832_v18 = vld [vmem:[%s2424_s0 + $0x8] sm:$0xf] }
  0x50   :  { %v586_v20 = vld.sshfl [vmem:[#allocation1] sm:$0xff pattern:$0x75316420] }
  0x51   :  { %637 = vst [vmem:[#allocation1] ss:$2 sm:$0xff] %v635_v19 }
  0x58   :  { %v638_v22 = vld.sshfl [vmem:[#allocation1] sm:$0xff pattern:$0x75316420] }
  0x59   :  { %693 = vst [vmem:[#allocation1] ss:$2 sm:$0xff] %v691_v21  ;;  %639 = vrot.lane.b32.xlu2 %v638_v22, %s1967_s7 }
  0x60   :  { %v694_v24 = vld.sshfl [vmem:[#allocation1] sm:$0xff pattern:$0x75316420] }
  0x61   :  { %745 = vst [vmem:[#allocation1] ss:$2 sm:$0xff] %v743_v23  ;;  %267 = vrot.lane.b32.xlu2 %v266_v10, %s1971_s26 }
  0x68   :  { %v746_v26 = vld.sshfl [vmem:[#allocation1] sm:$0xff pattern:$0x75316420] }
  0x69   :  { %747 = vrot.lane.b32.xlu1 %v746_v26, %s1969_s13  ;;  %801 = vst [vmem:[#allocation1] ss:$2 sm:$0xff] %v799_v25 }
  0x70   :  { %v802_v28 = vld.sshfl [vmem:[#allocation1] sm:$0xff pattern:$0x75316420] }
  0x71   :  { %375 = vrot.lane.b32.xlu1 %v374_v14, %s1972_s5  ;;  %853 = vst [vmem:[#allocation1] ss:$2 sm:$0xff] %v851_v27 }
  0x78   :  { %v854_v30 = vld.sshfl [vmem:[#allocation1] sm:$0xff pattern:$0x75316420] }
  0x79   :  { %855 = vrot.lane.b32.xlu0 %v854_v30, %s1970_s18  ;;  %959 = vst [vmem:[#allocation1] ss:$2 sm:$0xff] %v1836_v29  ;;  %587 = vrot.lane.b32.xlu1 %v586_v20, %s1968_s10 }
  0x80   :  { %v960_v32 = vld.sshfl [vmem:[#allocation1] sm:$0xff pattern:$0x75316420] }
  0x81   :  { %1015 = vst [vmem:[#allocation1] ss:$2 sm:$0xff] %v1840_v31  ;;  %961 = vrot.lane.b32.xlu2 %v960_v32, %s1966_s29 }
  0x83   :  { %v103_v41 = vpop.permute.xlu0 %102 }
  0x84   :  { %1787 = vmatpush.msk.msra.mxu2 %vm48_vm0, %v103_v41 }
  0x85   :  { %1788 = vmatmul.msk.f32.vlgmr.msra.gmra.mxu2 %vm44_vm1, %v2010_v1  ;;  %v69_v46 = vpop.f32.mrf.mxu0 }
  0x86   :  { %200 = vmatpush.msrb.mxu2 %v2102_v44  ;;  %1786 = vmatmul.msk.f32.vlgmr.msra.gmra.mxu1 %vm72_vm2, %v69_v46 }
  0x88   :  { %v1016_v34 = vld.sshfl [vmem:[#allocation1] sm:$0xff pattern:$0x75316420]  ;;  %201 = vmatpush.msrb.mxu2 %v2106_v45 }
  0x89   :  { %1067 = vst [vmem:[#allocation1] ss:$2 sm:$0xff] %v1844_v33 }
  0x8a   :  { %308 = vmatpush.msra.mxu2 %v2102_v44 }
  0x8c   :  { %309 = vmatpush.msra.mxu2 %v2106_v45 }
  0x90   :  { %v1068_v36 = vld.sshfl [vmem:[#allocation1] sm:$0xff pattern:$0x75316420] }
  0x91   :  { %1069 = vrot.lane.b32.xlu0 %v1068_v36, %s1967_s7  ;;  %1123 = vst [vmem:[#allocation1] ss:$2 sm:$0xff] %v1848_v35 }
  0x93   :  { %v212_v49 = vpop.permute.xlu0 %211 }
  0x94   :  { %1793 = vmatpush.msk.msrb.mxu1 %vm48_vm0, %v212_v49 }
  0x95   :  { %1794 = vmatmul.msk.f32.vlgmr.msrb.gmra.mxu1 %vm44_vm1, %v2010_v1 }
  0x98   :  { %v2086_v38 = vld.sshfl [vmem:[#allocation1] sm:$0xff pattern:$0x75316420] }
  0x99   :  { %1175 = vst [vmem:[#allocation1] ss:$2 sm:$0xff] %v1852_v37  ;;  %695 = vrot.lane.b32.xlu0 %v694_v24, %s1971_s26  ;;  %v1864_v37 = vld [vmem:[%s2424_s0 + $0xc] sm:$0xf]  ;;  %s1974_s0 = smov [#allocation5]  }
  0x9a   :  { %s1769_s17 = sshll.u32 %s1974_s0, 4  ;;  %s1770_s17 = int_to_ptr.vmem [resolvable:$true] %s1769_s17 }
  0x9b   :  { %v160_v56 = vpop.permute.xlu0 %159 }
  0x9c   :  { %1790 = vmatpush.msk.msrb.mxu0 %vm48_vm0, %v160_v56 }
  0x9d   :  { %1791 = vmatmul.msk.f32.vlgmr.msrb.gmra.mxu0 %vm44_vm1, %v2010_v1 }
  0xa0   :  { %v1176_v40 = vld.sshfl [vmem:[#allocation1] sm:$0xff pattern:$0x75316420] }
  0xa1   :  { %1231 = vst [vmem:[#allocation1] ss:$2 sm:$0xff] %v1856_v39  ;;  %1177 = vrot.lane.b32.xlu2 %v1176_v40, %s1969_s13 }
  0xa3   :  { %v320_v52 = vpop.permute.xlu1 %319  ;;  %v532_v55 = vpop.permute.xlu2 %531 }
  0xa4   :  { %1799 = vmatpush.msk.msra.mxu1 %vm48_vm0, %v320_v52 }
  0xa5   :  { %1800 = vmatmul.msk.f32.vlgmr.msra.gmra.mxu1 %vm44_vm1, %v2010_v1 }
  0xa8   :  { %v2099_v43 = vld.sshfl [vmem:[#allocation1] sm:$0xff pattern:$0x75316420] }
  0xa9   :  { %1283 = vst [vmem:[#allocation1] ss:$2 sm:$0xff] %v1860_v42  ;;  %803 = vrot.lane.b32.xlu2 %v802_v28, %s1972_s5 }
  0xb0   :  { %v1284_v48 = vld.sshfl [vmem:[#allocation1] sm:$0xff pattern:$0x75316420] }
  0xb1   :  { %1285 = vrot.lane.b32.xlu1 %v1284_v48, %s1970_s18  ;;  %1387 = vst [vmem:[#allocation1] ss:$2 sm:$0xff] %v1868_v47  ;;  %1017 = vrot.lane.b32.xlu2 %v1016_v34, %s1968_s10 }
  0xb3   :  { %v428_v58 = vpop.permute.xlu1 %427  ;;  %v640_v61 = vpop.permute.xlu2 %639 }
  0xb4   :  { %1805 = vmatpush.msk.msrb.mxu1 %vm48_vm0, %v428_v58 }
  0xb5   :  { %1806 = vmatmul.msk.f32.vlgmr.msrb.gmra.mxu1 %vm44_vm1, %v2010_v1 }
  0xb6   :  { %1811 = vmatpush.msk.msra.mxu1 %vm48_vm0, %v532_v55 }
  0xb8   :  { %v1388_v51 = vld.sshfl [vmem:[#allocation1] sm:$0xff pattern:$0x75316420]  ;;  %1817 = vmatpush.msk.msrb.mxu1 %vm48_vm0, %v640_v61 }
  0xb9   :  { %1389 = vrot.lane.b32.xlu0 %v1388_v51, %s1966_s29  ;;  %1443 = vst [vmem:[#allocation1] ss:$2 sm:$0xff] %v1872_v50 }
  0xbb   :  { %v268_v0 = vpop.permute.xlu2 %267 }
  0xbc   :  { %1796 = vmatpush.msk.msra.mxu0 %vm48_vm0, %v268_v0 }
  0xbd   :  { %1812 = vmatmul.msk.f32.vlgmr.msra.gmra.mxu1 %vm44_vm1, %v2010_v1  ;;  %1797 = vmatmul.msk.f32.vlgmr.msra.gmra.mxu0 %vm44_vm1, %v2010_v1 }
  0xc0   :  { %v1444_v54 = vld.sshfl [vmem:[#allocation1] sm:$0xff pattern:$0x75316420] }
  0xc1   :  { %1495 = vst [vmem:[#allocation1] ss:$2 sm:$0xff] %v1876_v53 }
  0xc5   :  { %1818 = vmatmul.msk.f32.vlgmr.msrb.gmra.mxu1 %vm44_vm1, %v2010_v1 }
  0xc8   :  { %v1496_v60 = vld.sshfl [vmem:[#allocation1] sm:$0xff pattern:$0x75316420] }
  0xc9   :  { %1497 = vrot.lane.b32.xlu1 %v1496_v60, %s1967_s7  ;;  %1551 = vst [vmem:[#allocation1] ss:$2 sm:$0xff] %v1880_v59 }
  0xd0   :  { %v1552_v63 = vld.sshfl [vmem:[#allocation1] sm:$0xff pattern:$0x75316420] }
  0xd1   :  { %1125 = vrot.lane.b32.xlu1 %v2086_v38, %s1971_s26  ;;  %1603 = vst [vmem:[#allocation1] ss:$2 sm:$0xff] %v1884_v62 }
  0xd8   :  { %v1604_v3 = vld.sshfl [vmem:[#allocation1] sm:$0xff pattern:$0x75316420] }
  0xd9   :  { %1605 = vrot.lane.b32.xlu0 %v1604_v3, %s1969_s13  ;;  %1659 = vst [vmem:[#allocation1] ss:$2 sm:$0xff] %v1888_v2  ;;  %1445 = vrot.lane.b32.xlu1 %v1444_v54, %s1968_s10 }
  0xdb   :  { %v748_v4 = vpop.permute.xlu1 %747  ;;  %v962_v11 = vpop.permute.xlu2 %961 }
  0xdc   :  { %1823 = vmatpush.msk.msra.mxu1 %vm48_vm0, %v748_v4 }
  0xdd   :  { %1824 = vmatmul.msk.f32.vlgmr.msra.gmra.mxu1 %vm44_vm1, %v2010_v1 }
  0xe0   :  { %v1660_v7 = vld.sshfl [vmem:[#allocation1] sm:$0xff pattern:$0x75316420] }
  0xe1   :  { %1233 = vrot.lane.b32.xlu0 %v2099_v43, %s1972_s5  ;;  %40 = vperm.xlu1 %1909, %v37_v5   ;;  %1711 = vst [vmem:[#allocation1] ss:$2 sm:$0xff] %v1892_v6 }
  0xe3   :  { %v376_v8 = vpop.permute.xlu1 %375 }
  0xe4   :  { %1802 = vmatpush.msk.msrb.mxu0 %vm48_vm0, %v376_v8 }
  0xe5   :  { %1803 = vmatmul.msk.f32.vlgmr.msrb.gmra.mxu0 %vm44_vm1, %v2010_v1 }
  0xe6   :  { %1808 = vmatpush.msk.msra.mxu0 %vm48_vm0, %v479_v9 }
  0xe8   :  { %v1712_v10 = vld.sshfl [vmem:[#allocation1] sm:$0xff pattern:$0x75316420] }
  0xe9   :  { %1713 = vrot.lane.b32.xlu2 %v1712_v10, %s1970_s18  ;;  %1661 = vrot.lane.b32.xlu0 %v1660_v7, %s1972_s5 }
  0xeb   :  { %v856_v12 = vpop.permute.xlu0 %855  ;;  %v588_v13 = vpop.permute.xlu1 %587 }
  0xec   :  { %1829 = vmatpush.msk.msrb.mxu1 %vm48_vm0, %v856_v12  ;;  %1814 = vmatpush.msk.msrb.mxu0 %vm48_vm0, %v588_v13 }
  0xed   :  { %1809 = vmatmul.msk.f32.vlgmr.msra.gmra.mxu0 %vm44_vm1, %v2010_v1  ;;  %1830 = vmatmul.msk.f32.vlgmr.msrb.gmra.mxu1 %vm44_vm1, %v2010_v1 }
  0xee   :  { %1837 = vmatpush.msk.msra.mxu1 %vm48_vm0, %v962_v11 }
  0xf1   :  { %1553 = vrot.lane.b32.xlu2 %v1552_v63, %s1971_s26 }
  0xf5   :  { %1815 = vmatmul.msk.f32.vlgmr.msrb.gmra.mxu0 %vm44_vm1, %v2010_v1  ;;  %1838 = vmatmul.msk.f32.vlgmr.msra.gmra.mxu1 %vm44_vm1, %v2010_v1 }
  0xfb   :  { %v1178_v14 = vpop.permute.xlu2 %1177 }
 0x103   :  { %v1070_v15 = vpop.permute.xlu0 %1069  ;;  %v804_v17 = vpop.permute.xlu2 %803 }
 0x104   :  { %1845 = vmatpush.msk.msrb.mxu1 %vm48_vm0, %v1070_v15  ;;  %v93_v21 = vpop.f32.mrf.mxu1 }
 0x105   :  { %1846 = vmatmul.msk.f32.vlgmr.msrb.gmra.mxu1 %vm44_vm1, %v2010_v1 }
 0x106   :  { %1853 = vmatpush.msk.msra.mxu1 %vm48_vm0, %v1178_v14 }
 0x108   :  { %v123_v22 = vpop.f32.mrf.mxu2 }
 0x109   :  { %1789 = vmatmul.msk.f32.vlgmr.msra.gmra.mxu3 %vm72_vm2, %v123_v22 }
 0x10a   :  { %360 = vmatpush.msra.mxu3 %v2102_v44 }
 0x10b   :  { %v696_v16 = vpop.permute.xlu0 %695  ;;  %v1018_v19 = vpop.permute.xlu2 %1017 }
 0x10c   :  { %1820 = vmatpush.msk.msra.mxu0 %vm48_vm0, %v696_v16  ;;  %361 = vmatpush.msra.mxu3 %v2106_v45 }
 0x10d   :  { %1821 = vmatmul.msk.f32.vlgmr.msra.gmra.mxu0 %vm44_vm1, %v2010_v1  ;;  %1854 = vmatmul.msk.f32.vlgmr.msra.gmra.mxu1 %vm44_vm1, %v2010_v1 }
 0x10e   :  { %1826 = vmatpush.msk.msrb.mxu0 %vm48_vm0, %v804_v17 }
 0x110   :  { %1833 = vmatpush.msk.msra.mxu0 %vm48_vm0, %v1832_v18 }
 0x112   :  { %v232_v24 = vpop.f32.mrf.mxu1 }
 0x113   :  { %1795 = vmatmul.msk.f32.vlgmr.msrb.gmra.mxu3 %vm72_vm2, %v232_v24 }
 0x114   :  { %468 = vmatpush.msrb.mxu3 %v2102_v44 }
 0x115   :  { %1827 = vmatmul.msk.f32.vlgmr.msrb.gmra.mxu0 %vm44_vm1, %v2010_v1 }
 0x116   :  { %1841 = vmatpush.msk.msrb.mxu0 %vm48_vm0, %v1018_v19  ;;  %469 = vmatpush.msrb.mxu3 %v2106_v45 }
 0x11a   :  { %v180_v30 = vpop.f32.mrf.mxu0 }
 0x11b   :  { %1792 = vmatmul.msk.f32.vlgmr.msrb.gmra.mxu2 %vm72_vm2, %v180_v30 }
 0x11c   :  { %416 = vmatpush.msrb.mxu2 %v2102_v44 }
 0x11d   :  { %1834 = vmatmul.msk.f32.vlgmr.msra.gmra.mxu0 %vm44_vm1, %v2010_v1 }
 0x11e   :  { %417 = vmatpush.msrb.mxu2 %v2106_v45 }
 0x122   :  { %v340_v25 = vpop.f32.mrf.mxu1 }
 0x123   :  { %v1286_v20 = vpop.permute.xlu1 %1285  ;;  %1801 = vmatmul.msk.f32.vlgmr.msra.gmra.mxu3 %vm72_vm2, %v340_v25 }
 0x124   :  { %1861 = vmatpush.msk.msrb.mxu1 %vm48_vm0, %v1286_v20  ;;  %572 = vmatpush.msra.mxu3 %v2102_v44 }
 0x125   :  { %1862 = vmatmul.msk.f32.vlgmr.msrb.gmra.mxu1 %vm44_vm1, %v2010_v1  ;;  %1842 = vmatmul.msk.f32.vlgmr.msrb.gmra.mxu0 %vm44_vm1, %v2010_v1 }
 0x126   :  { %573 = vmatpush.msra.mxu3 %v2106_v45 }
 0x12b   :  { %v1390_v23 = vpop.permute.xlu0 %1389 }
 0x12c   :  { %1869 = vmatpush.msk.msra.mxu1 %vm48_vm0, %v1390_v23 }
 0x12d   :  { %1870 = vmatmul.msk.f32.vlgmr.msra.gmra.mxu1 %vm44_vm1, %v2010_v1 }
 0x132   :  { %v448_v27 = vpop.f32.mrf.mxu1 }
 0x133   :  { %1807 = vmatmul.msk.f32.vlgmr.msrb.gmra.mxu3 %vm72_vm2, %v448_v27 }
 0x134   :  { %680 = vmatpush.msrb.mxu3 %v2102_v44 }
 0x136   :  { %681 = vmatpush.msrb.mxu3 %v2106_v45 }
 0x13a   :  { %v552_v31 = vpop.f32.mrf.mxu1  ;;  %v288_v34 = vpop.f32.mrf.mxu0 }
 0x13b   :  { %v1498_v26 = vpop.permute.xlu1 %1497  ;;  %1813 = vmatmul.msk.f32.vlgmr.msra.gmra.mxu3 %vm72_vm2, %v552_v31  ;;  %1798 = vmatmul.msk.f32.vlgmr.msra.gmra.mxu2 %vm72_vm2, %v288_v34 }
 0x13c   :  { %1877 = vmatpush.msk.msrb.mxu1 %vm48_vm0, %v1498_v26  ;;  %788 = vmatpush.msra.mxu3 %v2102_v44 }
 0x13d   :  { %1878 = vmatmul.msk.f32.vlgmr.msrb.gmra.mxu1 %vm44_vm1, %v2010_v1  ;;  %520 = vmatpush.msra.mxu2 %v2102_v44 }
 0x13e   :  { %789 = vmatpush.msra.mxu3 %v2106_v45 }
 0x13f   :  { %521 = vmatpush.msra.mxu2 %v2106_v45 }
 0x142   :  { %v660_v35 = vpop.f32.mrf.mxu1 }
 0x143   :  { %v1126_v28 = vpop.permute.xlu1 %1125  ;;  %v1714_v29 = vpop.permute.xlu2 %1713  ;;  %1819 = vmatmul.msk.f32.vlgmr.msrb.gmra.mxu3 %vm72_vm2, %v660_v35 }
 0x144   :  { %1849 = vmatpush.msk.msra.mxu0 %vm48_vm0, %v1126_v28  ;;  %896 = vmatpush.msrb.mxu3 %v2102_v44 }
 0x145   :  { %1850 = vmatmul.msk.f32.vlgmr.msra.gmra.mxu0 %vm44_vm1, %v2010_v1 }
 0x146   :  { %897 = vmatpush.msrb.mxu3 %v2106_v45 }
 0x14b   :  { %v1606_v32 = vpop.permute.xlu0 %1605  ;;  %v1446_v33 = vpop.permute.xlu1 %1445 }
 0x14c   :  { %1885 = vmatpush.msk.msra.mxu1 %vm48_vm0, %v1606_v32  ;;  %v1554_v41 = vpop.permute.xlu2 %1553 }
 0x14d   :  { %1886 = vmatmul.msk.f32.vlgmr.msra.gmra.mxu1 %vm44_vm1, %v2010_v1 }
 0x14e   :  { %1893 = vmatpush.msk.msrb.mxu1 %vm48_vm0, %v1714_v29 }
 0x153   :  { %v1234_v36 = vpop.permute.xlu0 %1233  ;;  %v2254_v38 = vpop.permute.xlu1 %40 }
 0x154   :  { %1857 = vmatpush.msk.msrb.mxu0 %vm48_vm0, %v1234_v36  ;;  %v94_v39 = vadd.f32 %v93_v21, %v2254_v38 }
 0x155   :  { %1858 = vmatmul.msk.f32.vlgmr.msrb.gmra.mxu0 %vm44_vm1, %v2010_v1  ;;  %1894 = vmatmul.msk.f32.vlgmr.msrb.gmra.mxu1 %vm44_vm1, %v2010_v1 }
 0x156   :  { %1865 = vmatpush.msk.msra.mxu0 %vm48_vm0, %v1864_v37  ;;  %97 = vst.msk [vmem:[#allocation5] sm:$0xff] %vm96_vm3, %v94_v39 }
 0x158   :  { %1873 = vmatpush.msk.msrb.mxu0 %vm48_vm0, %v1446_v33 }
 0x15a   :  { %v768_v40 = vpop.f32.mrf.mxu1 }
 0x15b   :  { %1825 = vmatmul.msk.f32.vlgmr.msra.gmra.mxu3 %vm72_vm2, %v768_v40  ;;  %v1662_v43 = vpop.permute.xlu0 %1661 }
 0x15c   :  { %1002 = vmatpush.msra.mxu3 %v2102_v44 }
 0x15d   :  { %1866 = vmatmul.msk.f32.vlgmr.msra.gmra.mxu0 %vm44_vm1, %v2010_v1 }
 0x15e   :  { %1881 = vmatpush.msk.msra.mxu0 %vm48_vm0, %v1554_v41  ;;  %1003 = vmatpush.msra.mxu3 %v2106_v45 }
 0x162   :  { %v396_v42 = vpop.f32.mrf.mxu0 }
 0x163   :  { %1804 = vmatmul.msk.f32.vlgmr.msrb.gmra.mxu2 %vm72_vm2, %v396_v42 }
 0x164   :  { %628 = vmatpush.msrb.mxu2 %v2102_v44 }
 0x165   :  { %1874 = vmatmul.msk.f32.vlgmr.msrb.gmra.mxu0 %vm44_vm1, %v2010_v1 }
 0x166   :  { %1889 = vmatpush.msk.msrb.mxu0 %vm48_vm0, %v1662_v43  ;;  %629 = vmatpush.msrb.mxu2 %v2106_v45 }
 0x16a   :  { %v500_v46 = vpop.f32.mrf.mxu0  ;;  %v876_v47 = vpop.f32.mrf.mxu1 }
 0x16b   :  { %1810 = vmatmul.msk.f32.vlgmr.msra.gmra.mxu2 %vm72_vm2, %v500_v46  ;;  %1831 = vmatmul.msk.f32.vlgmr.msrb.gmra.mxu3 %vm72_vm2, %v876_v47 }
 0x16c   :  { %736 = vmatpush.msra.mxu2 %v2102_v44  ;;  %1110 = vmatpush.msrb.mxu3 %v2102_v44 }
 0x16d   :  { %1882 = vmatmul.msk.f32.vlgmr.msra.gmra.mxu0 %vm44_vm1, %v2010_v1 }
 0x16e   :  { %737 = vmatpush.msra.mxu2 %v2106_v45  ;;  %1111 = vmatpush.msrb.mxu3 %v2106_v45 }
 0x172   :  { %v608_v48 = vpop.f32.mrf.mxu0  ;;  %v982_v49 = vpop.f32.mrf.mxu1 }
 0x173   :  { %1816 = vmatmul.msk.f32.vlgmr.msrb.gmra.mxu2 %vm72_vm2, %v608_v48  ;;  %1839 = vmatmul.msk.f32.vlgmr.msra.gmra.mxu3 %vm72_vm2, %v982_v49 }
 0x174   :  { %844 = vmatpush.msrb.mxu2 %v2102_v44  ;;  %1218 = vmatpush.msra.mxu3 %v2102_v44 }
 0x175   :  { %1890 = vmatmul.msk.f32.vlgmr.msrb.gmra.mxu0 %vm44_vm1, %v2010_v1 }
 0x176   :  { %845 = vmatpush.msrb.mxu2 %v2106_v45  ;;  %1219 = vmatpush.msra.mxu3 %v2106_v45 }
 0x182   :  { %v1090_v50 = vpop.f32.mrf.mxu1 }
 0x183   :  { %1847 = vmatmul.msk.f32.vlgmr.msrb.gmra.mxu3 %vm72_vm2, %v1090_v50 }
 0x184   :  { %1326 = vmatpush.msrb.mxu3 %v2102_v44 }
 0x186   :  { %1327 = vmatpush.msrb.mxu3 %v2106_v45 }
 0x18a   :  { %v716_v51 = vpop.f32.mrf.mxu0  ;;  %v1198_v52 = vpop.f32.mrf.mxu1 }
 0x18b   :  { %1822 = vmatmul.msk.f32.vlgmr.msra.gmra.mxu2 %vm72_vm2, %v716_v51  ;;  %1855 = vmatmul.msk.f32.vlgmr.msra.gmra.mxu3 %vm72_vm2, %v1198_v52 }
 0x18c   :  { %949 = vmatpush.msra.mxu2 %v2102_v44  ;;  %1430 = vmatpush.msra.mxu3 %v2102_v44  ;;  %v146_v57 = vpop.f32.mrf.mxu3 }
 0x18d   :  { %v147_v58 = vadd.f32 %v146_v57, %v2254_v38 }
 0x18e   :  { %950 = vmatpush.msra.mxu2 %v2106_v45  ;;  %1431 = vmatpush.msra.mxu3 %v2106_v45 }
 0x18f   :  { %150 = vrot.lane.b32.xlu2 %v147_v58, %s1971_s26 }
 0x192   :  { %v824_v1 = vpop.f32.mrf.mxu0 }
 0x193   :  { %1828 = vmatmul.msk.f32.vlgmr.msrb.gmra.mxu2 %vm72_vm2, %v824_v1 }
 0x194   :  { %1058 = vmatpush.msrb.mxu2 %v2102_v44 }
 0x196   :  { %1059 = vmatpush.msrb.mxu2 %v2106_v45  ;;  %v255_v59 = vpop.f32.mrf.mxu3 }
 0x197   :  { %v256_v61 = vadd.f32 %v255_v59, %v2254_v38 }
 0x199   :  { %259 = vrot.lane.b32.xlu0 %v256_v61, %s1971_s26 }
 0x19a   :  { %v929_v53 = vpop.f32.mrf.mxu0 }
 0x19b   :  { %1835 = vmatmul.msk.f32.vlgmr.msra.gmra.mxu2 %vm72_vm2, %v929_v53 }
 0x19c   :  { %1166 = vmatpush.msra.mxu2 %v2102_v44 }
 0x19e   :  { %1167 = vmatpush.msra.mxu2 %v2106_v45  ;;  %v203_v5 = vpop.f32.mrf.mxu2 }
 0x19f   :  { %v204_v9 = vadd.f32 %v203_v5, %v2254_v38 }
 0x1a1   :  { %206 = vst.msk [vmem:[#allocation5 + $0x8] sm:$0xff] %vm96_vm3, %v204_v9 }
 0x1a2   :  { %v1306_v54 = vpop.f32.mrf.mxu1  ;;  %v1038_v55 = vpop.f32.mrf.mxu0 }
 0x1a3   :  { %1863 = vmatmul.msk.f32.vlgmr.msrb.gmra.mxu3 %vm72_vm2, %v1306_v54  ;;  %1843 = vmatmul.msk.f32.vlgmr.msrb.gmra.mxu2 %vm72_vm2, %v1038_v55 }
 0x1a4   :  { %1538 = vmatpush.msrb.mxu3 %v2102_v44  ;;  %1274 = vmatpush.msrb.mxu2 %v2102_v44 }
 0x1a6   :  { %1539 = vmatpush.msrb.mxu3 %v2106_v45  ;;  %1275 = vmatpush.msrb.mxu2 %v2106_v45  ;;  %v363_v62 = vpop.f32.mrf.mxu3 }
 0x1a7   :  { %v364_v0 = vadd.f32 %v363_v62, %v2254_v38 }
 0x1a9   :  { %367 = vrot.lane.b32.xlu1 %v364_v0, %s1971_s26 }
 0x1aa   :  { %v1410_v56 = vpop.f32.mrf.mxu1 }
 0x1ab   :  { %1871 = vmatmul.msk.f32.vlgmr.msra.gmra.mxu3 %vm72_vm2, %v1410_v56 }
 0x1ac   :  { %1646 = vmatpush.msra.mxu3 %v2102_v44 }
 0x1ae   :  { %1647 = vmatpush.msra.mxu3 %v2106_v45 }
 0x1b6   :  { %v471_v2 = vpop.f32.mrf.mxu3 }
 0x1b7   :  { %v472_v4 = vadd.f32 %v471_v2, %v2254_v38 }
 0x1b9   :  { %475 = vrot.lane.b32.xlu2 %v472_v4, %s1971_s26 }
 0x1ba   :  { %v1518_v60 = vpop.f32.mrf.mxu1 }
 0x1bb   :  { %1879 = vmatmul.msk.f32.vlgmr.msrb.gmra.mxu3 %vm72_vm2, %v1518_v60 }
 0x1bc   :  { %1754 = vmatpush.msrb.mxu3 %v2102_v44 }
 0x1be   :  { %1755 = vmatpush.msrb.mxu3 %v2106_v45  ;;  %v575_v6 = vpop.f32.mrf.mxu3  ;;  %v311_v11 = vpop.f32.mrf.mxu2 }
 0x1bf   :  { %v576_v10 = vadd.f32 %v575_v6, %v2254_v38  ;;  %v312_v13 = vadd.f32 %v311_v11, %v2254_v38 }
 0x1c1   :  { %579 = vrot.lane.b32.xlu0 %v576_v10, %s1971_s26  ;;  %314 = vst.msk [vmem:[#allocation5 + $0x10] sm:$0xff] %vm96_vm3, %v312_v13 }
 0x1c2   :  { %v1146_v63 = vpop.f32.mrf.mxu0 }
 0x1c3   :  { %1851 = vmatmul.msk.f32.vlgmr.msra.gmra.mxu2 %vm72_vm2, %v1146_v63 }
 0x1c4   :  { %1378 = vmatpush.msra.mxu2 %v2102_v44 }
 0x1c6   :  { %1379 = vmatpush.msra.mxu2 %v2106_v45  ;;  %v683_v12 = vpop.f32.mrf.mxu3 }
 0x1c7   :  { %v684_v14 = vadd.f32 %v683_v12, %v2254_v38 }
 0x1c9   :  { %687 = vrot.lane.b32.xlu1 %v684_v14, %s1971_s26 }
 0x1ca   :  { %v1626_v3 = vpop.f32.mrf.mxu1 }
 0x1cb   :  { %1887 = vmatmul.msk.f32.vlgmr.msra.gmra.mxu3 %vm72_vm2, %v1626_v3 }
 0x1d2   :  { %v1254_v7 = vpop.f32.mrf.mxu0  ;;  %v1734_v8 = vpop.f32.mrf.mxu1 }
 0x1d3   :  { %1859 = vmatmul.msk.f32.vlgmr.msrb.gmra.mxu2 %vm72_vm2, %v1254_v7  ;;  %1895 = vmatmul.msk.f32.vlgmr.msrb.gmra.mxu3 %vm72_vm2, %v1734_v8 }
 0x1d4   :  { %1486 = vmatpush.msrb.mxu2 %v2102_v44 }
 0x1d6   :  { %1487 = vmatpush.msrb.mxu2 %v2106_v45 }
 0x1da   :  { %v1358_v15 = vpop.f32.mrf.mxu0 }
 0x1db   :  { %1867 = vmatmul.msk.f32.vlgmr.msra.gmra.mxu2 %vm72_vm2, %v1358_v15 }
 0x1dc   :  { %1594 = vmatpush.msra.mxu2 %v2102_v44 }
 0x1de   :  { %1595 = vmatpush.msra.mxu2 %v2106_v45  ;;  %v791_v16 = vpop.f32.mrf.mxu3 }
 0x1df   :  { %v792_v17 = vadd.f32 %v791_v16, %v2254_v38 }
 0x1e1   :  { %795 = vrot.lane.b32.xlu2 %v792_v17, %s1971_s26 }
 0x1e2   :  { %v1466_v18 = vpop.f32.mrf.mxu0 }
 0x1e3   :  { %1875 = vmatmul.msk.f32.vlgmr.msrb.gmra.mxu2 %vm72_vm2, %v1466_v18 }
 0x1e4   :  { %1702 = vmatpush.msrb.mxu2 %v2102_v44 }
 0x1e6   :  { %1703 = vmatpush.msrb.mxu2 %v2106_v45  ;;  %v419_v19 = vpop.f32.mrf.mxu2 }
 0x1e7   :  { %v420_v20 = vadd.f32 %v419_v19, %v2254_v38 }
 0x1e9   :  { %422 = vst.msk [vmem:[#allocation5 + $0x18] sm:$0xff] %vm96_vm3, %v420_v20  ;;  %v151_v37 = vpop.permute.xlu2 %150 }
 0x1ea   :  { %v1574_v21 = vpop.f32.mrf.mxu0  ;;  %154 = vst.msk [vmem:[#allocation5] sm:$0xff] %vm153_vm4, %v151_v37 }
 0x1eb   :  { %1883 = vmatmul.msk.f32.vlgmr.msra.gmra.mxu2 %vm72_vm2, %v1574_v21 }
 0x1ee   :  { %v523_v22 = vpop.f32.mrf.mxu2  ;;  %v899_v23 = vpop.f32.mrf.mxu3 }
 0x1ef   :  { %v524_v24 = vadd.f32 %v523_v22, %v2254_v38  ;;  %v900_v25 = vadd.f32 %v899_v23, %v2254_v38 }
 0x1f1   :  { %526 = vst.msk [vmem:[#allocation5 + $0x20] sm:$0xff] %vm96_vm3, %v524_v24  ;;  %903 = vrot.lane.b32.xlu0 %v900_v25, %s1971_s26 }
 0x1f2   :  { %v1682_v44 = vpop.f32.mrf.mxu0 }
 0x1f3   :  { %1891 = vmatmul.msk.f32.vlgmr.msrb.gmra.mxu2 %vm72_vm2, %v1682_v44 }
 0x1f6   :  { %v631_v45 = vpop.f32.mrf.mxu2  ;;  %v1005_v26 = vpop.f32.mrf.mxu3 }
 0x1f7   :  { %v632_v27 = vadd.f32 %v631_v45, %v2254_v38  ;;  %v1006_v28 = vadd.f32 %v1005_v26, %v2254_v38 }
 0x1f9   :  { %634 = vst.msk [vmem:[#allocation5 + $0x28] sm:$0xff] %vm96_vm3, %v632_v27  ;;  %1009 = vrot.lane.b32.xlu1 %v1006_v28, %s1971_s26 }
 0x206   :  { %v1113_v29 = vpop.f32.mrf.mxu3 }
 0x207   :  { %v1114_v30 = vadd.f32 %v1113_v29, %v2254_v38 }
 0x209   :  { %1117 = vrot.lane.b32.xlu2 %v1114_v30, %s1971_s26 }
 0x20b   :  { %v260_v50 = vpop.permute.xlu0 %259 }
 0x20c   :  { %262 = vst.msk [vmem:[#allocation5 + $0x8] sm:$0xff] %vm153_vm4, %v260_v50 }
 0x20e   :  { %v739_v31 = vpop.f32.mrf.mxu2  ;;  %v1221_v32 = vpop.f32.mrf.mxu3 }
 0x20f   :  { %v740_v33 = vadd.f32 %v739_v31, %v2254_v38  ;;  %v1222_v34 = vadd.f32 %v1221_v32, %v2254_v38 }
 0x211   :  { %742 = vst.msk [vmem:[#allocation5 + $0x30] sm:$0xff] %vm96_vm3, %v740_v33  ;;  %1225 = vrot.lane.b32.xlu0 %v1222_v34, %s1971_s26 }
 0x213   :  { %v476_v49 = vpop.permute.xlu2 %475 }
 0x214   :  { %478 = vst.msk [vmem:[#allocation5 + $0x18] sm:$0xff] %vm153_vm4, %v476_v49 }
 0x216   :  { %v847_v35 = vpop.f32.mrf.mxu2 }
 0x217   :  { %v848_v36 = vadd.f32 %v847_v35, %v2254_v38 }
 0x219   :  { %850 = vst.msk [vmem:[#allocation5 + $0x38] sm:$0xff] %vm96_vm3, %v848_v36 }
 0x21b   :  { %v368_v1 = vpop.permute.xlu1 %367 }
 0x21c   :  { %370 = vst.msk [vmem:[#allocation5 + $0x10] sm:$0xff] %vm153_vm4, %v368_v1 }
 0x21e   :  { %v952_v39 = vpop.f32.mrf.mxu2 }
 0x21f   :  { %v953_v40 = vadd.f32 %v952_v39, %v2254_v38 }
 0x221   :  { %956 = vst.msk [vmem:[#allocation5 + $0x40] sm:$0xff] %vm96_vm3, %v953_v40 }
 0x226   :  { %v1329_v41 = vpop.f32.mrf.mxu3  ;;  %v1061_v42 = vpop.f32.mrf.mxu2 }
 0x227   :  { %v1330_v43 = vadd.f32 %v1329_v41, %v2254_v38  ;;  %v1062_v46 = vadd.f32 %v1061_v42, %v2254_v38 }
 0x229   :  { %1064 = vst.msk [vmem:[#allocation5 + $0x48] sm:$0xff] %vm96_vm3, %v1062_v46  ;;  %1333 = vrot.lane.b32.xlu1 %v1330_v43, %s1971_s26 }
 0x22e   :  { %v1433_v47 = vpop.f32.mrf.mxu3 }
 0x22f   :  { %v1434_v48 = vadd.f32 %v1433_v47, %v2254_v38 }
 0x231   :  { %1437 = vrot.lane.b32.xlu2 %v1434_v48, %s1971_s26 }
 0x233   :  { %v580_v58 = vpop.permute.xlu0 %579 }
 0x234   :  { %582 = vst.msk [vmem:[#allocation5 + $0x20] sm:$0xff] %vm153_vm4, %v580_v58 }
 0x23b   :  { %v796_v55 = vpop.permute.xlu2 %795  ;;  %v688_v63 = vpop.permute.xlu1 %687 }
 0x23c   :  { %798 = vst.msk [vmem:[#allocation5 + $0x30] sm:$0xff] %vm153_vm4, %v796_v55 }
 0x23d   :  { %690 = vst.msk [vmem:[#allocation5 + $0x28] sm:$0xff] %vm153_vm4, %v688_v63 }
 0x23e   :  { %v1541_v51 = vpop.f32.mrf.mxu3 }
 0x23f   :  { %v1542_v52 = vadd.f32 %v1541_v51, %v2254_v38 }
 0x241   :  { %1545 = vrot.lane.b32.xlu0 %v1542_v52, %s1971_s26 }
 0x246   :  { %v1169_v53 = vpop.f32.mrf.mxu2 }
 0x247   :  { %v1170_v54 = vadd.f32 %v1169_v53, %v2254_v38 }
 0x249   :  { %1172 = vst.msk [vmem:[#allocation5 + $0x50] sm:$0xff] %vm96_vm3, %v1170_v54 }
 0x24e   :  { %v1649_v56 = vpop.f32.mrf.mxu3 }
 0x24f   :  { %v1650_v57 = vadd.f32 %v1649_v56, %v2254_v38 }
 0x251   :  { %1653 = vrot.lane.b32.xlu1 %v1650_v57, %s1971_s26 }
 0x256   :  { %v1277_v59 = vpop.f32.mrf.mxu2  ;;  %v1757_v60 = vpop.f32.mrf.mxu3 }
 0x257   :  { %v1278_v61 = vadd.f32 %v1277_v59, %v2254_v38  ;;  %v1758_v62 = vadd.f32 %v1757_v60, %v2254_v38 }
 0x259   :  { %1280 = vst.msk [vmem:[#allocation5 + $0x58] sm:$0xff] %vm96_vm3, %v1278_v61  ;;  %1761 = vrot.lane.b32.xlu2 %v1758_v62, %s1971_s26 }
 0x25e   :  { %v1381_v0 = vpop.f32.mrf.mxu2 }
 0x25f   :  { %v1382_v2 = vadd.f32 %v1381_v0, %v2254_v38 }
 0x261   :  { %1384 = vst.msk [vmem:[#allocation5 + $0x60] sm:$0xff] %vm96_vm3, %v1382_v2 }
 0x263   :  { %v1118_v3 = vpop.permute.xlu2 %1117  ;;  %v904_v6 = vpop.permute.xlu0 %903 }
 0x264   :  { %1120 = vst.msk [vmem:[#allocation5 + $0x48] sm:$0xff] %vm153_vm4, %v1118_v3 }
 0x265   :  { %906 = vst.msk [vmem:[#allocation5 + $0x38] sm:$0xff] %vm153_vm4, %v904_v6 }
 0x266   :  { %v1489_v4 = vpop.f32.mrf.mxu2 }
 0x267   :  { %v1490_v5 = vadd.f32 %v1489_v4, %v2254_v38 }
 0x269   :  { %1492 = vst.msk [vmem:[#allocation5 + $0x68] sm:$0xff] %vm96_vm3, %v1490_v5 }
 0x26b   :  { %v1010_v7 = vpop.permute.xlu1 %1009 }
 0x26c   :  { %1012 = vst.msk [vmem:[#allocation5 + $0x40] sm:$0xff] %vm153_vm4, %v1010_v7 }
 0x26e   :  { %v1597_v8 = vpop.f32.mrf.mxu2 }
 0x26f   :  { %v1598_v9 = vadd.f32 %v1597_v8, %v2254_v38 }
 0x271   :  { %1600 = vst.msk [vmem:[#allocation5 + $0x70] sm:$0xff] %vm96_vm3, %v1598_v9 }
 0x276   :  { %v1705_v10 = vpop.f32.mrf.mxu2 }
 0x277   :  { %v1706_v11 = vadd.f32 %v1705_v10, %v2254_v38 }
 0x279   :  { %1708 = vst.msk [vmem:[#allocation5 + $0x78] sm:$0xff] %vm96_vm3, %v1706_v11 }
 0x283   :  { %v1226_v12 = vpop.permute.xlu0 %1225 }
 0x284   :  { %1228 = vst.msk [vmem:[#allocation5 + $0x50] sm:$0xff] %vm153_vm4, %v1226_v12 }
 0x28b   :  { %v1438_v13 = vpop.permute.xlu2 %1437 }
 0x28c   :  { %1440 = vst.msk [vmem:[#allocation5 + $0x60] sm:$0xff] %vm153_vm4, %v1438_v13 }
 0x29b   :  { %v1334_v14 = vpop.permute.xlu1 %1333 }
 0x29c   :  { %1336 = vst.msk [vmem:[#allocation5 + $0x58] sm:$0xff] %vm153_vm4, %v1334_v14 }
 0x2b3   :  { %v1762_v15 = vpop.permute.xlu2 %1761  ;;  %v1546_v16 = vpop.permute.xlu0 %1545 }
 0x2b4   :  { %1764 = vst.msk [vmem:[#allocation5 + $0x78] sm:$0xff] %vm153_vm4, %v1762_v15 }
 0x2b5   :  { %1548 = vst.msk [vmem:[#allocation5 + $0x68] sm:$0xff] %vm153_vm4, %v1546_v16 }
 0x2c3   :  { %v1654_v38 = vpop.permute.xlu1 %1653 }
 0x2c4   :  { %1656 = vst.msk [vmem:[#allocation5 + $0x70] sm:$0xff] %vm153_vm4, %v1654_v38 }
 0x2c5   :  { %1777 = dma.vmem_to_hbm [thread:$0]  %s1770_s17, 2048, %s1772_s21, [#allocation4], %s1975_s22, %s1975_s22, %s1971_s26  }
 0x2c6   :  { %1961 = dma.done.wait [#allocation4], 2048  }
 0x2c7   :  { %1962 = vsyncadd [#allocation4], 4294965248 }
 0x2c8   :  { %1782 = vsyncpa [#allocation3], 1 }
 0x2c9   :  { %1783 = vsyncpa [#allocation4], 1 }

</bundles_post_ra>
